<compile_context>
chip_gen: v5e
topology: v5e:2x2
jax: 0.10.0
libtpu: 0.0.40
codegen_flags: <defaults>
</compile_context>

<pallas_src>
import functools

import jax
import jax.numpy as jnp
from jax import lax
from jax.experimental import pallas as pl
from jax.experimental.pallas import tpu as pltpu

BN_EPS = 1e-5
_LANE = 128
_SUBLANE = 8
_VMEM_SOFT_LIMIT = 48 * 1024 * 1024   # headroom under v7x's 64 MiB physical VMEM


def _pick_strip_rows(h):
    """Largest nice divisor of h (8 preferred) for strip-wise processing."""
    for rs in (8, 4, 2):
        if h % rs == 0:
            return rs
    return h


# ----------------------------------------------------------------------------
# In-kernel helpers
# ----------------------------------------------------------------------------
def _dw_taps_strip(slab, dw, lmask, rmask, *, RS, W):
    """9-tap 3x3 depthwise (stride 1) on one RS-row strip.

    slab: (RS+2, W, Chid) = padded rows [r0, r0+RS+2) of h1 (zero halo rows).
    Column neighbours come from pltpu.roll (XLU, sublane axis) + edge mask, so
    no sublane-misaligned slices are ever read.  Taps are grouped by column
    shift so only one rolled copy of the slab is live at a time.
    """
    # centre column (dj = 1)
    acc = slab[0:RS] * dw[1] + slab[1:RS + 1] * dw[4] + slab[2:RS + 2] * dw[7]
    # left neighbour (dj = 0): value at column j-1, wrapped column 0 masked
    sl = pltpu.roll(slab, 1, 1) * lmask
    acc = acc + sl[0:RS] * dw[0] + sl[1:RS + 1] * dw[3] + sl[2:RS + 2] * dw[6]
    # right neighbour (dj = 2): value at column j+1, wrapped column W-1 masked
    sr = pltpu.roll(slab, W - 1, 1) * rmask
    acc = acc + sr[0:RS] * dw[2] + sr[1:RS + 1] * dw[5] + sr[2:RS + 2] * dw[8]
    return acc


def _fused_s1_body(x_ref, w1_ref, b1_ref, dw_ref, b2_ref, w3_ref, b3_ref,
                   out_ref, pad_ref, shortcut, *, H, W, RS):
    Chid = w1_ref.shape[1]

    # Row halo only (columns handled by roll+mask).  Re-zeroed every grid step
    # because the batch axis is "parallel" (per-core scratch); it is just two
    # tiny aligned row stores, hidden under the expand matmul.
    zrow = jnp.zeros((1, W, Chid), jnp.float32)
    pad_ref[0:1, :, :] = zrow
    pad_ref[H + 1:H + 2, :, :] = zrow

    # 1x1 expand + BN1 + ReLU for the whole image (one big MXU matmul), stored
    # once into the row-padded scratch (aligned interior store).
    h1 = jnp.dot(x_ref[...].astype(jnp.bfloat16), w1_ref[...],
                 preferred_element_type=jnp.float32)
    h1 = jnp.maximum(h1 + b1_ref[...], 0.0)
    pad_ref[1:H + 1, :, :] = h1.reshape(H, W, Chid)

    dw = dw_ref[...]                                  # (9, Chid), BN2 folded in
    b2 = b2_ref[...]                                  # (1, Chid)
    w3 = w3_ref[...]                                  # (Chid, Cout) bf16
    b3 = b3_ref[...]                                  # (1, Cout)
    col = lax.broadcasted_iota(jnp.int32, (W, Chid), 0)
    lmask = (col > 0).astype(jnp.float32)             # zero wrapped column 0
    rmask = (col < W - 1).astype(jnp.float32)         # zero wrapped column W-1

    # Strip-wise depthwise + BN2 + ReLU + 1x1 project + shortcut.
    def strip(t, carry):
        r0 = pl.multiple_of(t * RS, RS)
        slab = pad_ref[pl.ds(r0, RS + 2), :, :]
        acc = _dw_taps_strip(slab, dw, lmask, rmask, RS=RS, W=W)
        h2 = jnp.maximum(acc + b2, 0.0).reshape(RS * W, Chid)
        o = jnp.dot(h2.astype(jnp.bfloat16), w3,
                    preferred_element_type=jnp.float32) + b3
        row0 = pl.multiple_of(t * (RS * W), RS * W)
        out_ref[pl.ds(row0, RS * W), :] = o + shortcut(row0, RS * W)
        return carry

    lax.fori_loop(0, H // RS, strip, 0)


# ----------------------------------------------------------------------------
# Fused kernels (one batch element per grid step)
# ----------------------------------------------------------------------------
def _fused_s1_identity_kernel(x_ref, w1_ref, b1_ref, dw_ref, b2_ref,
                              w3_ref, b3_ref, out_ref, pad_ref, *, H, W, RS):
    def shortcut(row0, nrows):
        return x_ref[pl.ds(row0, nrows), :]           # identity residual (f32)

    _fused_s1_body(x_ref, w1_ref, b1_ref, dw_ref, b2_ref, w3_ref, b3_ref,
                   out_ref, pad_ref, shortcut, H=H, W=W, RS=RS)


def _fused_s1_scconv_kernel(x_ref, w1_ref, b1_ref, dw_ref, b2_ref,
                            w3_ref, b3_ref, ws_ref, bs_ref,
                            out_ref, pad_ref, *, H, W, RS):
    ws = ws_ref[...]
    bs = bs_ref[...]

    def shortcut(row0, nrows):
        xs = x_ref[pl.ds(row0, nrows), :].astype(jnp.bfloat16)
        return jnp.dot(xs, ws, preferred_element_type=jnp.float32) + bs

    _fused_s1_body(x_ref, w1_ref, b1_ref, dw_ref, b2_ref, w3_ref, b3_ref,
                   out_ref, pad_ref, shortcut, H=H, W=W, RS=RS)


def _fused_s2_kernel(xq_ref, w1_ref, b1_ref, dw_ref, b2_ref,
                     w3_ref, b3_ref, out_ref,
                     ee_ref, eo_ref, oe_ref, oo_ref, *, Ho, Wo, RS):
    # xq_ref holds the 4 spatial parity groups of x, order [ee, eo, oe, oo],
    # flattened to (4*Ho*Wo, Cin).  Only the Ho x Wo strided outputs are
    # computed; stride-2 3x3 taps only ever need a top / left zero halo.
    Chid = w1_ref.shape[1]
    n = Ho * Wo

    zrow = jnp.zeros((1, Wo, Chid), jnp.float32)
    oe_ref[0:1, :, :] = zrow
    oo_ref[0:1, :, :] = zrow

    h1 = jnp.dot(xq_ref[...].astype(jnp.bfloat16), w1_ref[...],
                 preferred_element_type=jnp.float32)
    h1 = jnp.maximum(h1 + b1_ref[...], 0.0)           # (4n, Chid)

    ee_ref[...] = h1[0 * n:1 * n].reshape(Ho, Wo, Chid)
    eo_ref[...] = h1[1 * n:2 * n].reshape(Ho, Wo, Chid)
    oe_ref[1:Ho + 1, :, :] = h1[2 * n:3 * n].reshape(Ho, Wo, Chid)
    oo_ref[1:Ho + 1, :, :] = h1[3 * n:4 * n].reshape(Ho, Wo, Chid)

    dw = dw_ref[...]                                  # (9, Chid), k = 3*di + dj
    b2 = b2_ref[...]
    w3 = w3_ref[...]
    b3 = b3_ref[...]
    col = lax.broadcasted_iota(jnp.int32, (Wo, Chid), 0)
    lmask = (col > 0).astype(jnp.float32)             # zero wrapped column 0

    def strip(t, carry):
        r0 = pl.multiple_of(t * RS, RS)
        ee = ee_ref[pl.ds(r0, RS), :, :]              # h1 rows 2*io,   cols even
        eo = eo_ref[pl.ds(r0, RS), :, :]              # h1 rows 2*io,   cols odd
        oes = oe_ref[pl.ds(r0, RS + 1), :, :]         # odd rows io-1..io (padded)
        oos = oo_ref[pl.ds(r0, RS + 1), :, :]         # odd rows io-1..io (padded)
        # taps needing no column shift
        acc = (ee * dw[4] + eo * dw[5]
               + oes[0:RS] * dw[1] + oos[0:RS] * dw[2]
               + oes[1:RS + 1] * dw[7] + oos[1:RS + 1] * dw[8])
        # left-neighbour (jo-1) taps via sublane roll + edge mask
        oos_l = pltpu.roll(oos, 1, 1) * lmask
        acc = acc + oos_l[0:RS] * dw[0] + oos_l[1:RS + 1] * dw[6]
        eo_l = pltpu.roll(eo, 1, 1) * lmask
        acc = acc + eo_l * dw[3]

        h2 = jnp.maximum(acc + b2, 0.0).reshape(RS * Wo, Chid)
        o = jnp.dot(h2.astype(jnp.bfloat16), w3,
                    preferred_element_type=jnp.float32) + b3
        row0 = pl.multiple_of(t * (RS * Wo), RS * Wo)
        out_ref[pl.ds(row0, RS * Wo), :] = o          # no shortcut at stride 2
        return carry

    lax.fori_loop(0, Ho // RS, strip, 0)


# ----------------------------------------------------------------------------
# Wrapper
# ----------------------------------------------------------------------------
def _bn_scale_bias(gamma, beta, mean, var):
    s = gamma / jnp.sqrt(var + BN_EPS)
    return s, beta - mean * s


def _full_spec(shape):
    return pl.BlockSpec(shape, lambda b, _n=len(shape): (0,) * _n)


def _round_up(x, m):
    return (x + m - 1) // m * m


def _padded_bytes(shape):
    """Conservative VMEM footprint of one f32 buffer with (8,128) tile padding."""
    if len(shape) == 1:
        return _round_up(shape[0] * 4, 512)
    lead = 1
    for d in shape[:-2]:
        lead *= d
    return lead * _round_up(shape[-2], _SUBLANE) * _round_up(shape[-1], _LANE) * 4


def _vmem_limit(block_shapes, scratch_shapes):
    est = sum(2 * _padded_bytes(s) for s in block_shapes)     # double buffers
    est += sum(_padded_bytes(s) for s in scratch_shapes)
    est += 1 << 20                                            # slack
    return int(min(max(2 * est, 16 << 20), _VMEM_SOFT_LIMIT))


def _cost_estimate(N, hw_in, hw_out, Cin, Chid, Cout, conv_shortcut):
    flops = (2 * hw_in * Cin * Chid          # expand 1x1
             + 18 * hw_out * Chid            # 3x3 depthwise
             + 2 * hw_out * Chid * Cout)     # project 1x1
    if conv_shortcut:
        flops += 2 * hw_out * Cin * Cout
    bytes_accessed = (4 * N * (hw_in * Cin + hw_out * Cout)
                      + 4 * (Cin * Chid + 9 * Chid + Chid * Cout
                             + 2 * Chid + 2 * Cout))
    return pl.CostEstimate(flops=int(N * flops), transcendentals=0,
                           bytes_accessed=int(bytes_accessed))


def inverted_residual_forward(x_nchw, params, *, stride):
    assert stride in (1, 2)
    N, Cin, H, W = x_nchw.shape
    Chid = params["w1"].shape[0]            # conv1 weight: (Chid, Cin, 1, 1)
    Cout = params["w3"].shape[0]            # conv3 weight: (Cout, Chid, 1, 1)
    identity = (stride == 1) and (Cin == Cout)

    s1, b1 = _bn_scale_bias(*params["bn1"])
    s2, b2 = _bn_scale_bias(*params["bn2"])
    s3, b3 = _bn_scale_bias(*params["bn3"])

    # Fold BN scales into the conv weights; keep only per-channel biases.
    w1 = (params["w1"][:, :, 0, 0] * s1[:, None]).T.astype(jnp.bfloat16)   # (Cin, Chid)
    dw = (params["w2"][:, 0, :, :].reshape(Chid, 9) * s2[:, None]).T       # (9, Chid)
    w3 = (params["w3"][:, :, 0, 0] * s3[:, None]).T.astype(jnp.bfloat16)   # (Chid, Cout)
    dw = dw.astype(jnp.float32)
    b1 = b1[None, :].astype(jnp.float32)
    b2 = b2[None, :].astype(jnp.float32)
    b3 = b3[None, :].astype(jnp.float32)

    x = jnp.transpose(x_nchw, (0, 2, 3, 1)).astype(jnp.float32)            # NHWC

    if stride == 1:
        assert W % 8 == 0, "TODO(synk): pad W to a multiple of 8"
        HW = H * W
        RS = _pick_strip_rows(H)
        x_flat = x.reshape(N, HW, Cin)

        in_specs = [
            pl.BlockSpec((None, HW, Cin), lambda b: (b, 0, 0)),
            _full_spec((Cin, Chid)), _full_spec((1, Chid)),
            _full_spec((9, Chid)), _full_spec((1, Chid)),
            _full_spec((Chid, Cout)), _full_spec((1, Cout)),
        ]
        args = [x_flat, w1, b1, dw, b2, w3, b3]
        block_shapes = [(HW, Cin), (Cin, Chid), (1, Chid), (9, Chid), (1, Chid),
                        (Chid, Cout), (1, Cout), (HW, Cout)]
        scratch_shapes_py = [(H + 2, W, Chid)]

        if identity:
            kern = functools.partial(_fused_s1_identity_kernel, H=H, W=W, RS=RS)
        else:
            ss, bs = _bn_scale_bias(*params["bns"])
            ws = (params["ws"][:, :, 0, 0] * ss[:, None]).T.astype(jnp.bfloat16)
            bs = bs[None, :].astype(jnp.float32)
            in_specs += [_full_spec((Cin, Cout)), _full_spec((1, Cout))]
            args += [ws, bs]
            block_shapes += [(Cin, Cout), (1, Cout)]
            kern = functools.partial(_fused_s1_scconv_kernel, H=H, W=W, RS=RS)

        out_flat = pl.pallas_call(
            kern,
            out_shape=jax.ShapeDtypeStruct((N, HW, Cout), jnp.float32),
            grid=(N,),
            in_specs=in_specs,
            out_specs=pl.BlockSpec((None, HW, Cout), lambda b: (b, 0, 0)),
            scratch_shapes=[pltpu.VMEM(s, jnp.float32) for s in scratch_shapes_py],
            compiler_params=pltpu.CompilerParams(
                dimension_semantics=("parallel",),
                vmem_limit_bytes=_vmem_limit(block_shapes, scratch_shapes_py)),
            cost_estimate=_cost_estimate(N, HW, HW, Cin, Chid, Cout,
                                         conv_shortcut=not identity),
        )(*args)
        Ho, Wo = H, W
    else:
        assert H % 2 == 0 and W % 2 == 0
        Ho, Wo = H // 2, W // 2
        assert Wo % 8 == 0, "TODO(synk): pad Wo to a multiple of 8"
        RS = _pick_strip_rows(Ho)
        n = Ho * Wo
        # Parity split of x (small, Cin channels) done by XLA.
        xq = jnp.stack(
            [x[:, 0::2, 0::2, :], x[:, 0::2, 1::2, :],
             x[:, 1::2, 0::2, :], x[:, 1::2, 1::2, :]], axis=1,
        ).reshape(N, 4 * n, Cin)

        block_shapes = [(4 * n, Cin), (Cin, Chid), (1, Chid), (9, Chid),
                        (1, Chid), (Chid, Cout), (1, Cout), (n, Cout)]
        scratch_shapes_py = [(Ho, Wo, Chid), (Ho, Wo, Chid),
                             (Ho + 1, Wo, Chid), (Ho + 1, Wo, Chid)]
        kern = functools.partial(_fused_s2_kernel, Ho=Ho, Wo=Wo, RS=RS)
        out_flat = pl.pallas_call(
            kern,
            out_shape=jax.ShapeDtypeStruct((N, n, Cout), jnp.float32),
            grid=(N,),
            in_specs=[
                pl.BlockSpec((None, 4 * n, Cin), lambda b: (b, 0, 0)),
                _full_spec((Cin, Chid)), _full_spec((1, Chid)),
                _full_spec((9, Chid)), _full_spec((1, Chid)),
                _full_spec((Chid, Cout)), _full_spec((1, Cout)),
            ],
            out_specs=pl.BlockSpec((None, n, Cout), lambda b: (b, 0, 0)),
            scratch_shapes=[pltpu.VMEM(s, jnp.float32) for s in scratch_shapes_py],
            compiler_params=pltpu.CompilerParams(
                dimension_semantics=("parallel",),
                vmem_limit_bytes=_vmem_limit(block_shapes, scratch_shapes_py)),
            cost_estimate=_cost_estimate(N, 4 * n, n, Cin, Chid, Cout,
                                         conv_shortcut=False),
        )(xq, w1, b1, dw, b2, w3, b3)

    out = out_flat.reshape(N, Ho, Wo, Cout)
    return jnp.transpose(out, (0, 3, 1, 2))                      # back to NCHW


# ----------------------------------------------------------------------------
# Pure-JAX reference (mirrors the PyTorch forward, NCHW, eval-mode BN, f32)
# ----------------------------------------------------------------------------
def ref_forward_nchw(x, params, *, stride):
    Cin = x.shape[1]
    Chid = params["w1"].shape[0]

    def conv(x, w, s=1, padding="VALID", groups=1):
        return lax.conv_general_dilated(
            x, w, (s, s), padding, feature_group_count=groups,
            dimension_numbers=("NCHW", "OIHW", "NCHW"),
            precision=lax.Precision.HIGHEST)

    def bn(x, p):
        gamma, beta, mean, var = p
        s = gamma / jnp.sqrt(var + BN_EPS)
        return x * s[None, :, None, None] + (beta - mean * s)[None, :, None, None]

    out = jax.nn.relu(bn(conv(x, params["w1"]), params["bn1"]))
    out = jax.nn.relu(bn(conv(out, params["w2"], s=stride,
                              padding=((1, 1), (1, 1)), groups=Chid),
                         params["bn2"]))
    out = bn(conv(out, params["w3"]), params["bn3"])
    if stride == 1:
        if Cin == params["w3"].shape[0]:
            out = out + x
        else:
            out = out + bn(conv(x, params["ws"]), params["bns"])
    return out


# ----------------------------------------------------------------------------
# Deterministic parameter construction
# ----------------------------------------------------------------------------
def make_bn(key, C):
    k1, k2, k3, k4 = jax.random.split(key, 4)
    gamma = 1.0 + 0.1 * jax.random.normal(k1, (C,), jnp.float32)
    beta = 0.1 * jax.random.normal(k2, (C,), jnp.float32)
    mean = 0.1 * jax.random.normal(k3, (C,), jnp.float32)
    var = jax.random.uniform(k4, (C,), jnp.float32, 0.5, 1.5)
    return (gamma, beta, mean, var)


def make_params(key, Cin, Cout, stride, expand_ratio):
    Chid = int(round(Cin * expand_ratio))
    ks = jax.random.split(key, 8)
    p = {
        "w1": 0.2 * jax.random.normal(ks[0], (Chid, Cin, 1, 1), jnp.float32),
        "bn1": make_bn(ks[1], Chid),
        "w2": 0.2 * jax.random.normal(ks[2], (Chid, 1, 3, 3), jnp.float32),
        "bn2": make_bn(ks[3], Chid),
        "w3": 0.2 * jax.random.normal(ks[4], (Cout, Chid, 1, 1), jnp.float32),
        "bn3": make_bn(ks[5], Cout),
    }
    if stride == 1 and Cin != Cout:
        p["ws"] = 0.2 * jax.random.normal(ks[6], (Cout, Cin, 1, 1), jnp.float32)
        p["bns"] = make_bn(ks[7], Cout)
    return p


if __name__ == "__main__":
    root = jax.random.PRNGKey(0)
    configs = [
        dict(N=2, Cin=8, Cout=16, H=16, W=16, stride=1, expand=3),  # conv shortcut
        dict(N=2, Cin=8, Cout=8,  H=16, W=16, stride=1, expand=2),  # identity shortcut
        dict(N=2, Cin=8, Cout=16, H=16, W=16, stride=2, expand=4),  # no shortcut
    ]
    for idx, cfg in enumerate(configs):
        kx, kp = jax.random.split(jax.random.fold_in(root, idx))
        x = jax.random.normal(kx, (cfg["N"], cfg["Cin"], cfg["H"], cfg["W"]),
                              jnp.float32)
        params = make_params(kp, cfg["Cin"], cfg["Cout"], cfg["stride"],
                             cfg["expand"])
        out = inverted_residual_forward(x, params, stride=cfg["stride"])
        out = jax.block_until_ready(out)
        ref = ref_forward_nchw(x, params, stride=cfg["stride"])
        assert out.shape == ref.shape, (out.shape, ref.shape)
        # bf16 MXU operands -> compare against the f32 reference at ~1e-2 level.
        assert bool(jnp.allclose(out, ref, atol=5e-2, rtol=5e-2)), (
            f"mismatch in config {cfg}: "
            f"max abs err {float(jnp.max(jnp.abs(out - ref)))}")
    print("KERNEL_OK")
</pallas_src>

<mosaic_0001>
module attributes {stable_mosaic.version = 11 : i64} {
  func.func @_fused_s1_scconv_kernel(%arg0: i32, %arg1: memref<1x256x8xf32, #tpu.memory_space<vmem>>, %arg2: memref<8x24xbf16, #tpu.memory_space<vmem>>, %arg3: memref<1x24xf32, #tpu.memory_space<vmem>>, %arg4: memref<9x24xf32, #tpu.memory_space<vmem>>, %arg5: memref<1x24xf32, #tpu.memory_space<vmem>>, %arg6: memref<24x16xbf16, #tpu.memory_space<vmem>>, %arg7: memref<1x16xf32, #tpu.memory_space<vmem>>, %arg8: memref<8x16xbf16, #tpu.memory_space<vmem>>, %arg9: memref<1x16xf32, #tpu.memory_space<vmem>>, %arg10: memref<1x256x16xf32, #tpu.memory_space<vmem>>, %arg11: memref<18x16x24xf32, #tpu.memory_space<vmem>>) attributes {dimension_semantics = [#tpu.dimension_semantics<parallel>], iteration_bounds = array<i64: 2>, scalar_prefetch = 0 : i64, scratch_operands = 1 : i64, tpu.core_type = #tpu.core_type<tc>, window_params = [{transform_indices = @transform_0, window_bounds = array<i64: 1, 256, 8>}, {pipeline_mode = #tpu.pipeline_mode<synchronous>, transform_indices = @transform_1, window_bounds = array<i64: 8, 24>}, {pipeline_mode = #tpu.pipeline_mode<synchronous>, transform_indices = @transform_2, window_bounds = array<i64: 1, 24>}, {pipeline_mode = #tpu.pipeline_mode<synchronous>, transform_indices = @transform_3, window_bounds = array<i64: 9, 24>}, {pipeline_mode = #tpu.pipeline_mode<synchronous>, transform_indices = @transform_4, window_bounds = array<i64: 1, 24>}, {pipeline_mode = #tpu.pipeline_mode<synchronous>, transform_indices = @transform_5, window_bounds = array<i64: 24, 16>}, {pipeline_mode = #tpu.pipeline_mode<synchronous>, transform_indices = @transform_6, window_bounds = array<i64: 1, 16>}, {pipeline_mode = #tpu.pipeline_mode<synchronous>, transform_indices = @transform_7, window_bounds = array<i64: 8, 16>}, {pipeline_mode = #tpu.pipeline_mode<synchronous>, transform_indices = @transform_8, window_bounds = array<i64: 1, 16>}, {transform_indices = @transform_9, window_bounds = array<i64: 1, 256, 16>}]} {
    %c0 = arith.constant 0 : index
    %c0_0 = arith.constant 0 : index
    %0 = vector.load %arg8[%c0, %c0_0] : memref<8x16xbf16, #tpu.memory_space<vmem>>, vector<8x16xbf16>
    %c0_1 = arith.constant 0 : index
    %c0_2 = arith.constant 0 : index
    %1 = vector.load %arg9[%c0_1, %c0_2] : memref<1x16xf32, #tpu.memory_space<vmem>>, vector<1x16xf32>
    %cst = arith.constant 0.000000e+00 : f32
    %2 = vector.broadcast %cst : f32 to vector<1x16x24xf32>
    %c0_3 = arith.constant 0 : index
    %c0_4 = arith.constant 0 : index
    %c0_5 = arith.constant 0 : index
    %3 = vector.load %arg11[%c0_3, %c0_4, %c0_5] : memref<18x16x24xf32, #tpu.memory_space<vmem>>, vector<1x16x24xf32>
    tpu.vector_store %arg11[%c0_3, %c0_4, %c0_5], %2 {strides = array<i32>} : memref<18x16x24xf32, #tpu.memory_space<vmem>>, vector<1x16x24xf32>,
    %c17 = arith.constant 17 : index
    %c0_6 = arith.constant 0 : index
    %c0_7 = arith.constant 0 : index
    %4 = vector.load %arg11[%c17, %c0_6, %c0_7] : memref<18x16x24xf32, #tpu.memory_space<vmem>>, vector<1x16x24xf32>
    tpu.vector_store %arg11[%c17, %c0_6, %c0_7], %2 {strides = array<i32>} : memref<18x16x24xf32, #tpu.memory_space<vmem>>, vector<1x16x24xf32>,
    %c0_8 = arith.constant 0 : index
    %c0_9 = arith.constant 0 : index
    %c0_10 = arith.constant 0 : index
    %5 = vector.load %arg1[%c0_8, %c0_9, %c0_10] : memref<1x256x8xf32, #tpu.memory_space<vmem>>, vector<1x256x8xf32>
    %6 = vector.shape_cast %5 : vector<1x256x8xf32> to vector<256x8xf32>
    %7 = arith.truncf %6 : vector<256x8xf32> to vector<256x8xbf16>
    %c0_11 = arith.constant 0 : index
    %c0_12 = arith.constant 0 : index
    %8 = vector.load %arg2[%c0_11, %c0_12] : memref<8x24xbf16, #tpu.memory_space<vmem>>, vector<8x24xbf16>
    %cst_13 = arith.constant dense<0.000000e+00> : vector<256x24xf32>
    %9 = tpu.matmul %7, %8, %cst_13 {dimension_numbers = #tpu.dot_dimension_numbers<[1], [0], [0], [1], [0, 0, 1, 1], [], []>} : vector<256x8xbf16>, vector<8x24xbf16>, vector<256x24xf32> -> vector<256x24xf32>
    %c0_14 = arith.constant 0 : index
    %c0_15 = arith.constant 0 : index
    %10 = vector.load %arg3[%c0_14, %c0_15] : memref<1x24xf32, #tpu.memory_space<vmem>>, vector<1x24xf32>
    %11 = vector.broadcast %10 : vector<1x24xf32> to vector<256x24xf32>
    %12 = arith.addf %9, %11 : vector<256x24xf32>
    %cst_16 = arith.constant 0.000000e+00 : f32
    %13 = vector.broadcast %cst_16 : f32 to vector<256x24xf32>
    %14 = arith.maximumf %12, %13 : vector<256x24xf32>
    %15 = vector.shape_cast %14 : vector<256x24xf32> to vector<16x16x24xf32>
    %c1 = arith.constant 1 : index
    %c0_17 = arith.constant 0 : index
    %c0_18 = arith.constant 0 : index
    %16 = vector.load %arg11[%c1, %c0_17, %c0_18] : memref<18x16x24xf32, #tpu.memory_space<vmem>>, vector<16x16x24xf32>
    tpu.vector_store %arg11[%c1, %c0_17, %c0_18], %15 {strides = array<i32>} : memref<18x16x24xf32, #tpu.memory_space<vmem>>, vector<16x16x24xf32>,
    %c0_19 = arith.constant 0 : index
    %c0_20 = arith.constant 0 : index
    %17 = vector.load %arg4[%c0_19, %c0_20] : memref<9x24xf32, #tpu.memory_space<vmem>>, vector<9x24xf32>
    %c0_21 = arith.constant 0 : index
    %c0_22 = arith.constant 0 : index
    %18 = vector.load %arg5[%c0_21, %c0_22] : memref<1x24xf32, #tpu.memory_space<vmem>>, vector<1x24xf32>
    %c0_23 = arith.constant 0 : index
    %c0_24 = arith.constant 0 : index
    %19 = vector.load %arg6[%c0_23, %c0_24] : memref<24x16xbf16, #tpu.memory_space<vmem>>, vector<24x16xbf16>
    %c0_25 = arith.constant 0 : index
    %c0_26 = arith.constant 0 : index
    %20 = vector.load %arg7[%c0_25, %c0_26] : memref<1x16xf32, #tpu.memory_space<vmem>>, vector<1x16xf32>
    %21 = tpu.iota {dimensions = array<i32: 0>} : vector<16x24xi32>
    %c0_i32 = arith.constant 0 : i32
    %22 = vector.broadcast %c0_i32 : i32 to vector<16x24xi32>
    %23 = arith.cmpi sgt, %21, %22 : vector<16x24xi32>
    %24 = arith.extui %23 : vector<16x24xi1> to vector<16x24xi32>
    %25 = arith.sitofp %24 : vector<16x24xi32> to vector<16x24xf32>
    %c15_i32 = arith.constant 15 : i32
    %26 = vector.broadcast %c15_i32 : i32 to vector<16x24xi32>
    %27 = arith.cmpi slt, %21, %26 : vector<16x24xi32>
    %28 = arith.extui %27 : vector<16x24xi1> to vector<16x24xi32>
    %29 = arith.sitofp %28 : vector<16x24xi32> to vector<16x24xf32>
    %c0_i32_27 = arith.constant 0 : i32
    %c2_i32 = arith.constant 2 : i32
    %30 = arith.addi %c0_i32_27, %c2_i32 : i32
    %c1_i32 = arith.constant 1 : i32
    scf.for %arg12 = %c0_i32_27 to %30 step %c1_i32  : i32 {
      %c8_i32 = arith.constant 8 : i32
      %31 = arith.muli %arg12, %c8_i32 : i32
      %32 = tpu.assume_multiple %31, 8 : i32
      %33 = arith.index_cast %32 : i32 to index
      %c0_29 = arith.constant 0 : index
      %c0_30 = arith.constant 0 : index
      %34 = vector.load %arg11[%33, %c0_29, %c0_30] : memref<18x16x24xf32, #tpu.memory_space<vmem>>, vector<10x16x24xf32>
      %35 = vector.extract_strided_slice %34 {offsets = [0, 0, 0], sizes = [8, 16, 24], strides = [1, 1, 1]} : vector<10x16x24xf32> to vector<8x16x24xf32>
      %36 = vector.extract_strided_slice %17 {offsets = [1, 0], sizes = [1, 24], strides = [1, 1]} : vector<9x24xf32> to vector<1x24xf32>
      %37 = vector.shape_cast %36 : vector<1x24xf32> to vector<24xf32>
      %38 = vector.shape_cast %37 : vector<24xf32> to vector<1x1x24xf32>
      %39 = vector.broadcast %38 : vector<1x1x24xf32> to vector<8x16x24xf32>
      %40 = arith.mulf %35, %39 : vector<8x16x24xf32>
      %41 = vector.extract_strided_slice %34 {offsets = [1, 0, 0], sizes = [8, 16, 24], strides = [1, 1, 1]} : vector<10x16x24xf32> to vector<8x16x24xf32>
      %42 = vector.extract_strided_slice %17 {offsets = [4, 0], sizes = [1, 24], strides = [1, 1]} : vector<9x24xf32> to vector<1x24xf32>
      %43 = vector.shape_cast %42 : vector<1x24xf32> to vector<24xf32>
      %44 = vector.shape_cast %43 : vector<24xf32> to vector<1x1x24xf32>
      %45 = vector.broadcast %44 : vector<1x1x24xf32> to vector<8x16x24xf32>
      %46 = arith.mulf %41, %45 : vector<8x16x24xf32>
      %47 = arith.addf %40, %46 : vector<8x16x24xf32>
      %48 = vector.extract_strided_slice %34 {offsets = [2, 0, 0], sizes = [8, 16, 24], strides = [1, 1, 1]} : vector<10x16x24xf32> to vector<8x16x24xf32>
      %49 = vector.extract_strided_slice %17 {offsets = [7, 0], sizes = [1, 24], strides = [1, 1]} : vector<9x24xf32> to vector<1x24xf32>
      %50 = vector.shape_cast %49 : vector<1x24xf32> to vector<24xf32>
      %51 = vector.shape_cast %50 : vector<24xf32> to vector<1x1x24xf32>
      %52 = vector.broadcast %51 : vector<1x1x24xf32> to vector<8x16x24xf32>
      %53 = arith.mulf %48, %52 : vector<8x16x24xf32>
      %54 = arith.addf %47, %53 : vector<8x16x24xf32>
      %c1_i32_31 = arith.constant 1 : i32
      %55 = tpu.dynamic_rotate %34 by %c1_i32_31 dim 1 : vector<10x16x24xf32>, i32 -> vector<10x16x24xf32>
      %56 = vector.shape_cast %25 : vector<16x24xf32> to vector<1x16x24xf32>
      %57 = vector.broadcast %56 : vector<1x16x24xf32> to vector<10x16x24xf32>
      %58 = arith.mulf %55, %57 : vector<10x16x24xf32>
      %59 = vector.extract_strided_slice %58 {offsets = [0, 0, 0], sizes = [8, 16, 24], strides = [1, 1, 1]} : vector<10x16x24xf32> to vector<8x16x24xf32>
      %60 = vector.extract_strided_slice %17 {offsets = [0, 0], sizes = [1, 24], strides = [1, 1]} : vector<9x24xf32> to vector<1x24xf32>
      %61 = vector.shape_cast %60 : vector<1x24xf32> to vector<24xf32>
      %62 = vector.shape_cast %61 : vector<24xf32> to vector<1x1x24xf32>
      %63 = vector.broadcast %62 : vector<1x1x24xf32> to vector<8x16x24xf32>
      %64 = arith.mulf %59, %63 : vector<8x16x24xf32>
      %65 = arith.addf %54, %64 : vector<8x16x24xf32>
      %66 = vector.extract_strided_slice %58 {offsets = [1, 0, 0], sizes = [8, 16, 24], strides = [1, 1, 1]} : vector<10x16x24xf32> to vector<8x16x24xf32>
      %67 = vector.extract_strided_slice %17 {offsets = [3, 0], sizes = [1, 24], strides = [1, 1]} : vector<9x24xf32> to vector<1x24xf32>
      %68 = vector.shape_cast %67 : vector<1x24xf32> to vector<24xf32>
      %69 = vector.shape_cast %68 : vector<24xf32> to vector<1x1x24xf32>
      %70 = vector.broadcast %69 : vector<1x1x24xf32> to vector<8x16x24xf32>
      %71 = arith.mulf %66, %70 : vector<8x16x24xf32>
      %72 = arith.addf %65, %71 : vector<8x16x24xf32>
      %73 = vector.extract_strided_slice %58 {offsets = [2, 0, 0], sizes = [8, 16, 24], strides = [1, 1, 1]} : vector<10x16x24xf32> to vector<8x16x24xf32>
      %74 = vector.extract_strided_slice %17 {offsets = [6, 0], sizes = [1, 24], strides = [1, 1]} : vector<9x24xf32> to vector<1x24xf32>
      %75 = vector.shape_cast %74 : vector<1x24xf32> to vector<24xf32>
      %76 = vector.shape_cast %75 : vector<24xf32> to vector<1x1x24xf32>
      %77 = vector.broadcast %76 : vector<1x1x24xf32> to vector<8x16x24xf32>
      %78 = arith.mulf %73, %77 : vector<8x16x24xf32>
      %79 = arith.addf %72, %78 : vector<8x16x24xf32>
      %c15_i32_32 = arith.constant 15 : i32
      %80 = tpu.dynamic_rotate %34 by %c15_i32_32 dim 1 : vector<10x16x24xf32>, i32 -> vector<10x16x24xf32>
      %81 = vector.shape_cast %29 : vector<16x24xf32> to vector<1x16x24xf32>
      %82 = vector.broadcast %81 : vector<1x16x24xf32> to vector<10x16x24xf32>
      %83 = arith.mulf %80, %82 : vector<10x16x24xf32>
      %84 = vector.extract_strided_slice %83 {offsets = [0, 0, 0], sizes = [8, 16, 24], strides = [1, 1, 1]} : vector<10x16x24xf32> to vector<8x16x24xf32>
      %85 = vector.extract_strided_slice %17 {offsets = [2, 0], sizes = [1, 24], strides = [1, 1]} : vector<9x24xf32> to vector<1x24xf32>
      %86 = vector.shape_cast %85 : vector<1x24xf32> to vector<24xf32>
      %87 = vector.shape_cast %86 : vector<24xf32> to vector<1x1x24xf32>
      %88 = vector.broadcast %87 : vector<1x1x24xf32> to vector<8x16x24xf32>
      %89 = arith.mulf %84, %88 : vector<8x16x24xf32>
      %90 = arith.addf %79, %89 : vector<8x16x24xf32>
      %91 = vector.extract_strided_slice %83 {offsets = [1, 0, 0], sizes = [8, 16, 24], strides = [1, 1, 1]} : vector<10x16x24xf32> to vector<8x16x24xf32>
      %92 = vector.extract_strided_slice %17 {offsets = [5, 0], sizes = [1, 24], strides = [1, 1]} : vector<9x24xf32> to vector<1x24xf32>
      %93 = vector.shape_cast %92 : vector<1x24xf32> to vector<24xf32>
      %94 = vector.shape_cast %93 : vector<24xf32> to vector<1x1x24xf32>
      %95 = vector.broadcast %94 : vector<1x1x24xf32> to vector<8x16x24xf32>
      %96 = arith.mulf %91, %95 : vector<8x16x24xf32>
      %97 = arith.addf %90, %96 : vector<8x16x24xf32>
      %98 = vector.extract_strided_slice %83 {offsets = [2, 0, 0], sizes = [8, 16, 24], strides = [1, 1, 1]} : vector<10x16x24xf32> to vector<8x16x24xf32>
      %99 = vector.extract_strided_slice %17 {offsets = [8, 0], sizes = [1, 24], strides = [1, 1]} : vector<9x24xf32> to vector<1x24xf32>
      %100 = vector.shape_cast %99 : vector<1x24xf32> to vector<24xf32>
      %101 = vector.shape_cast %100 : vector<24xf32> to vector<1x1x24xf32>
      %102 = vector.broadcast %101 : vector<1x1x24xf32> to vector<8x16x24xf32>
      %103 = arith.mulf %98, %102 : vector<8x16x24xf32>
      %104 = arith.addf %97, %103 : vector<8x16x24xf32>
      %105 = vector.shape_cast %18 : vector<1x24xf32> to vector<1x1x24xf32>
      %106 = vector.broadcast %105 : vector<1x1x24xf32> to vector<8x16x24xf32>
      %107 = arith.addf %104, %106 : vector<8x16x24xf32>
      %cst_33 = arith.constant 0.000000e+00 : f32
      %108 = vector.broadcast %cst_33 : f32 to vector<8x16x24xf32>
      %109 = arith.maximumf %107, %108 : vector<8x16x24xf32>
      %110 = vector.shape_cast %109 : vector<8x16x24xf32> to vector<128x24xf32>
      %111 = arith.truncf %110 : vector<128x24xf32> to vector<128x24xbf16>
      %cst_34 = arith.constant dense<0.000000e+00> : vector<128x16xf32>
      %112 = tpu.matmul %111, %19, %cst_34 {dimension_numbers = #tpu.dot_dimension_numbers<[1], [0], [0], [1], [0, 0, 1, 1], [], []>} : vector<128x24xbf16>, vector<24x16xbf16>, vector<128x16xf32> -> vector<128x16xf32>
      %113 = vector.broadcast %20 : vector<1x16xf32> to vector<128x16xf32>
      %114 = arith.addf %112, %113 : vector<128x16xf32>
      %c128_i32 = arith.constant 128 : i32
      %115 = arith.muli %arg12, %c128_i32 : i32
      %116 = tpu.assume_multiple %115, 128 : i32
      %c0_35 = arith.constant 0 : index
      %117 = arith.index_cast %116 : i32 to index
      %c0_36 = arith.constant 0 : index
      %118 = vector.load %arg1[%c0_35, %117, %c0_36] : memref<1x256x8xf32, #tpu.memory_space<vmem>>, vector<1x128x8xf32>
      %119 = vector.shape_cast %118 : vector<1x128x8xf32> to vector<128x8xf32>
      %120 = arith.truncf %119 : vector<128x8xf32> to vector<128x8xbf16>
      %cst_37 = arith.constant dense<0.000000e+00> : vector<128x16xf32>
      %121 = tpu.matmul %120, %0, %cst_37 {dimension_numbers = #tpu.dot_dimension_numbers<[1], [0], [0], [1], [0, 0, 1, 1], [], []>} : vector<128x8xbf16>, vector<8x16xbf16>, vector<128x16xf32> -> vector<128x16xf32>
      %122 = vector.broadcast %1 : vector<1x16xf32> to vector<128x16xf32>
      %123 = arith.addf %121, %122 : vector<128x16xf32>
      %124 = arith.addf %114, %123 : vector<128x16xf32>
      %c0_38 = arith.constant 0 : index
      %125 = arith.index_cast %116 : i32 to index
      %c0_39 = arith.constant 0 : index
      %126 = vector.load %arg10[%c0_38, %125, %c0_39] : memref<1x256x16xf32, #tpu.memory_space<vmem>>, vector<1x128x16xf32>
      %127 = vector.shape_cast %126 : vector<1x128x16xf32> to vector<128x16xf32>
      %128 = vector.shape_cast %124 : vector<128x16xf32> to vector<1x128x16xf32>
      tpu.vector_store %arg10[%c0_38, %125, %c0_39], %128 {strides = array<i32>} : memref<1x256x16xf32, #tpu.memory_space<vmem>>, vector<1x128x16xf32>,
    }
    %c2_i32_28 = arith.constant 2 : i32
    return
  }
  func.func @transform_0(%arg0: i32) -> (i32, i32, i32) {
    %c0_i32 = arith.constant 0 : i32
    %c0_i32_0 = arith.constant 0 : i32
    %c0_i32_1 = arith.constant 0 : i32
    return %arg0, %c0_i32, %c0_i32_0 : i32, i32, i32
  }
  func.func @transform_1(%arg0: i32) -> (i32, i32) {
    %c0_i32 = arith.constant 0 : i32
    %c0_i32_0 = arith.constant 0 : i32
    %c0_i32_1 = arith.constant 0 : i32
    return %c0_i32, %c0_i32_0 : i32, i32
  }
  func.func @transform_2(%arg0: i32) -> (i32, i32) {
    %c0_i32 = arith.constant 0 : i32
    %c0_i32_0 = arith.constant 0 : i32
    %c0_i32_1 = arith.constant 0 : i32
    return %c0_i32, %c0_i32_0 : i32, i32
  }
  func.func @transform_3(%arg0: i32) -> (i32, i32) {
    %c0_i32 = arith.constant 0 : i32
    %c0_i32_0 = arith.constant 0 : i32
    %c0_i32_1 = arith.constant 0 : i32
    return %c0_i32, %c0_i32_0 : i32, i32
  }
  func.func @transform_4(%arg0: i32) -> (i32, i32) {
    %c0_i32 = arith.constant 0 : i32
    %c0_i32_0 = arith.constant 0 : i32
    %c0_i32_1 = arith.constant 0 : i32
    return %c0_i32, %c0_i32_0 : i32, i32
  }
  func.func @transform_5(%arg0: i32) -> (i32, i32) {
    %c0_i32 = arith.constant 0 : i32
    %c0_i32_0 = arith.constant 0 : i32
    %c0_i32_1 = arith.constant 0 : i32
    return %c0_i32, %c0_i32_0 : i32, i32
  }
  func.func @transform_6(%arg0: i32) -> (i32, i32) {
    %c0_i32 = arith.constant 0 : i32
    %c0_i32_0 = arith.constant 0 : i32
    %c0_i32_1 = arith.constant 0 : i32
    return %c0_i32, %c0_i32_0 : i32, i32
  }
  func.func @transform_7(%arg0: i32) -> (i32, i32) {
    %c0_i32 = arith.constant 0 : i32
    %c0_i32_0 = arith.constant 0 : i32
    %c0_i32_1 = arith.constant 0 : i32
    return %c0_i32, %c0_i32_0 : i32, i32
  }
  func.func @transform_8(%arg0: i32) -> (i32, i32) {
    %c0_i32 = arith.constant 0 : i32
    %c0_i32_0 = arith.constant 0 : i32
    %c0_i32_1 = arith.constant 0 : i32
    return %c0_i32, %c0_i32_0 : i32, i32
  }
  func.func @transform_9(%arg0: i32) -> (i32, i32, i32) {
    %c0_i32 = arith.constant 0 : i32
    %c0_i32_0 = arith.constant 0 : i32
    %c0_i32_1 = arith.constant 0 : i32
    return %arg0, %c0_i32, %c0_i32_0 : i32, i32, i32
  }
}

</mosaic_0001>

<bundles_post_ra>
// kernel: tpu_custom_call.1
= control target key start
LH: loop header
LB: loop body
LE: loop exit
PB: predicated region body
PF: predicated region fallthrough
CT: control target
= control target key end

     0   :  { %s1539_s30 = smov 0   ;;  %s2464_s0 = inlined_call_operand.vmem [shape: f32[2,256,8], index: 0, kind: input, shape index: {}]   ;;  %s2465_s1 = inlined_call_operand.vmem [shape: bf16[8,24], index: 1, kind: input, shape index: {}]   ;;  %s2466_s2 = inlined_call_operand.vmem [shape: f32[1,24], index: 2, kind: input, shape index: {}]   ;;  %s2467_s3 = inlined_call_operand.vmem [shape: f32[9,24], index: 3, kind: input, shape index: {}]   ;;  %s2468_s4 = inlined_call_operand.vmem [shape: f32[1,24], index: 4, kind: input, shape index: {}]   ;;  %s2469_s5 = inlined_call_operand.vmem [shape: bf16[24,16], index: 5, kind: input, shape index: {}]   ;;  %s2470_s6 = inlined_call_operand.vmem [shape: f32[1,16], index: 6, kind: input, shape index: {}]   ;;  %s2471_s7 = inlined_call_operand.vmem [shape: bf16[8,16], index: 7, kind: input, shape index: {}]   ;;  %s2472_s8 = inlined_call_operand.vmem [shape: f32[1,16], index: 8, kind: input, shape index: {}]   ;;  %s2473_s9 = inlined_call_operand.vmem [shape: f32[2,256,16], index: 9, kind: output, shape index: {}]  }
   0x1 LB: > { %s1392_s10 = sadd.s32 4294967295, %s1482_s30   ;;  %p1396_p0 = scmp.ge.s32.totalorder %s1482_s30, 1  ;;  %s1482_s30 = sphi %s1539_s30, %s19_s30  }
   0x2   : > { %p287_p1 = scmp.lt.s32.totalorder %s1482_s30, 3 }
   0x4   : > { %p288_p2 = pnand %p1396_p0, %p287_p1 }
   0x5   : > { %p323_p3 = scmp.lt.s32.totalorder (!%p288_p2), %s1392_s10, 1  ;;  %s1741_s21 = smov (!%p288_p2), 0  }
   0x6   : > { %291 = sbr.rel (%p288_p2) target bundleno = 478 (0x1de), region = 56 }
   0xb   : > { %v1550_v0 = vld [vmem:[%s2471_s7] sm:$0xf]  ;;  %vm444_vm0 = vcmask 1043456   ;;  %s2537_s10 = smov (!%p323_p3, %s1392_s10), 1  ;;  %vm395_vm1 = vcmask 64512   ;;  %vm336_vm2 = vcmask 195584  }
   0xc   : > { %2490 = vst [vmem:[#allocation3_spill] sm:$0xff] %v1550_v0  ;;  %v1555_v1 = vld [vmem:[%s2472_s8] sm:$0x1]  ;;  %s1444_s17 = sshll.u32 %s2537_s10, 8  ;;  %v1488_v28 = vmov 0.0  }
   0xd   : > { %2491 = vst [vmem:[#allocation4_spill] sm:$0xff] %v1555_v1  ;;  %v390_v2 = vld [vmem:[%s2465_s1] sm:$0xf]  ;;  %s1564_s20 = scalar_lea.vmem %s2464_s0, %s1444_s17  ;;  %s1569_s23 = scalar_lea.vmem %s2473_s9, %s1444_s17 }
   0xe   : > { %v446_v3 = vsel %vm444_vm0, %v390_v2, 0  ;;  %v342_v4 = vld [vmem:[%s1564_s20] sm:$0xff]  ;;  %v343_v5 = vld [vmem:[%s1564_s20 + $0x8] sm:$0xff]  ;;  %v344_v16 = vld [vmem:[%s1564_s20 + $0x10] sm:$0xff]  ;;  %337 = vst.msk [vmem:[#allocation2] sm:$0xff] %vm336_vm2, %v1488_v28 }
   0xf   : > { %455 = vmatpush.bf16.msra.mxu0 %v446_v3  ;;  %1448 = vmatpush.bf16.msra.mxu1 %v446_v3  ;;  %v350_v6 = vld [vmem:[%s1564_s20 + $0x40] sm:$0xff]  ;;  %v374_v7 = vpack.c.bf16 %v343_v5, %v342_v4  ;;  %v351_v8 = vld [vmem:[%s1564_s20 + $0x48] sm:$0xff]  ;;  %v345_v17 = vld [vmem:[%s1564_s20 + $0x18] sm:$0xff]  ;;  %338 = vst.msk [vmem:[#allocation2 + $0x8] sm:$0xff] %vm336_vm2, %v1488_v28 }
  0x10   : > { %1449 = vmatpush.bf16.msra.mxu2 %v446_v3  ;;  %1450 = vmatpush.bf16.msra.mxu3 %v446_v3  ;;  %v358_v9 = vld [vmem:[%s1564_s20 + $0x80] sm:$0xff]  ;;  %v359_v10 = vld [vmem:[%s1564_s20 + $0x88] sm:$0xff]  ;;  %v378_v11 = vpack.c.bf16 %v351_v8, %v350_v6  ;;  %v352_v18 = vld [vmem:[%s1564_s20 + $0x50] sm:$0xff]  ;;  %v375_v24 = vpack.c.bf16 %v345_v17, %v344_v16  ;;  %340 = vst.msk [vmem:[#allocation2 + $0x110] sm:$0xff] %vm336_vm2, %v1488_v28 }
  0x11   : > { %v382_v12 = vpack.c.bf16 %v359_v10, %v358_v9  ;;  %v366_v13 = vld [vmem:[%s1564_s20 + $0xc0] sm:$0xff]  ;;  %v367_v14 = vld [vmem:[%s1564_s20 + $0xc8] sm:$0xff]  ;;  %v353_v19 = vld [vmem:[%s1564_s20 + $0x58] sm:$0xff]  ;;  %341 = vst.msk [vmem:[#allocation2 + $0x118] sm:$0xff] %vm336_vm2, %v1488_v28 }
  0x12   : > { %1401 = vmatmul.msk.bf16.vlgmr.msra.gmra.mxu0 %vm395_vm1, %v374_v7  ;;  %v386_v15 = vpack.c.bf16 %v367_v14, %v366_v13  ;;  %1405 = vmatmul.msk.bf16.vlgmr.msra.gmra.mxu1 %vm395_vm1, %v378_v11  ;;  %v360_v20 = vld [vmem:[%s1564_s20 + $0x90] sm:$0xff]  ;;  %v361_v21 = vld [vmem:[%s1564_s20 + $0x98] sm:$0xff]  ;;  %v379_v25 = vpack.c.bf16 %v353_v19, %v352_v18  ;;  %v346_v29 = vld [vmem:[%s1564_s20 + $0x20] sm:$0xff] }
  0x13   : > { %1409 = vmatmul.msk.bf16.vlgmr.msra.gmra.mxu2 %vm395_vm1, %v382_v12  ;;  %v368_v22 = vld [vmem:[%s1564_s20 + $0xd0] sm:$0xff]  ;;  %v369_v23 = vld [vmem:[%s1564_s20 + $0xd8] sm:$0xff]  ;;  %v383_v26 = vpack.c.bf16 %v361_v21, %v360_v20  ;;  %v347_v30 = vld [vmem:[%s1564_s20 + $0x28] sm:$0xff] }
  0x14   : > { %1413 = vmatmul.msk.bf16.vlgmr.msra.gmra.mxu3 %vm395_vm1, %v386_v15  ;;  %v387_v27 = vpack.c.bf16 %v369_v23, %v368_v22  ;;  %v354_v31 = vld [vmem:[%s1564_s20 + $0x60] sm:$0xff]  ;;  %v355_v32 = vld [vmem:[%s1564_s20 + $0x68] sm:$0xff]  ;;  %v376_v37 = vpack.c.bf16 %v347_v30, %v346_v29  ;;  %v348_v41 = vld [vmem:[%s1564_s20 + $0x30] sm:$0xff] }
  0x15   : > { %v362_v33 = vld [vmem:[%s1564_s20 + $0xa0] sm:$0xff]  ;;  %v363_v34 = vld [vmem:[%s1564_s20 + $0xa8] sm:$0xff]  ;;  %v380_v38 = vpack.c.bf16 %v355_v32, %v354_v31  ;;  %v349_v42 = vld [vmem:[%s1564_s20 + $0x38] sm:$0xff] }
  0x16   : > { %v370_v35 = vld [vmem:[%s1564_s20 + $0xe0] sm:$0xff]  ;;  %v371_v36 = vld [vmem:[%s1564_s20 + $0xe8] sm:$0xff]  ;;  %v384_v39 = vpack.c.bf16 %v363_v34, %v362_v33  ;;  %v356_v43 = vld [vmem:[%s1564_s20 + $0x70] sm:$0xff]  ;;  %v377_v49 = vpack.c.bf16 %v349_v42, %v348_v41 }
  0x17   : > { %v388_v40 = vpack.c.bf16 %v371_v36, %v370_v35  ;;  %v357_v44 = vld [vmem:[%s1564_s20 + $0x78] sm:$0xff]  ;;  %v364_v45 = vld [vmem:[%s1564_s20 + $0xb0] sm:$0xff]  ;;  %v1630_v53 = vld [vmem:[%s2466_s2] ss:$0 sm:$0xff]  ;;  %v609_v35 = vlaneseq }
  0x18   : > { %v365_v46 = vld [vmem:[%s1564_s20 + $0xb8] sm:$0xff]  ;;  %v372_v47 = vld [vmem:[%s1564_s20 + $0xf0] sm:$0xff]  ;;  %v381_v50 = vpack.c.bf16 %v357_v44, %v356_v43 }
  0x19   : > { %v373_v48 = vld [vmem:[%s1564_s20 + $0xf8] sm:$0xff]  ;;  %v385_v51 = vpack.c.bf16 %v365_v46, %v364_v45 }
  0x1a   : > { %v389_v52 = vpack.c.bf16 %v373_v48, %v372_v47 }
  0x22   : > { %1402 = vmatmul.msk.bf16.gmra.mxu0 %vm395_vm1, %v375_v24  ;;  %1406 = vmatmul.msk.bf16.gmra.mxu1 %vm395_vm1, %v379_v25 }
  0x23   : > { %1410 = vmatmul.msk.bf16.gmra.mxu2 %vm395_vm1, %v383_v26 }
  0x24   : > { %1414 = vmatmul.msk.bf16.gmra.mxu3 %vm395_vm1, %v387_v27 }
  0x32   : > { %1403 = vmatmul.msk.bf16.gmra.mxu0 %vm395_vm1, %v376_v37  ;;  %1407 = vmatmul.msk.bf16.gmra.mxu1 %vm395_vm1, %v380_v38 }
  0x33   : > { %1411 = vmatmul.msk.bf16.gmra.mxu2 %vm395_vm1, %v384_v39 }
  0x34   : > { %1415 = vmatmul.msk.bf16.gmra.mxu3 %vm395_vm1, %v388_v40  ;;  %v1661_v40 = vshrl.u32 %v609_v35, 7 }
  0x36   : > { %v611_v46 = vadd.s32 8, %v1661_v40  ;;  %vm612_vm3 = vcmp.gt.s32.totalorder %v1661_v40, 0 }
  0x38   : > { %vm619_vm4 = vcmp.lt.s32.totalorder %v611_v46, 15 }
  0x42   : > { %1404 = vmatmul.msk.bf16.gmra.mxu0 %vm395_vm1, %v377_v49  ;;  %1408 = vmatmul.msk.bf16.gmra.mxu1 %vm395_vm1, %v381_v50  ;;  %v1673_v50 = vld [vmem:[%s2467_s3] sm:$0xff] }
  0x43   : > { %1412 = vmatmul.msk.bf16.gmra.mxu2 %vm395_vm1, %v385_v51  ;;  %2492 = vst [vmem:[#allocation5_spill] sm:$0xff] %v1673_v50  ;;  %v1678_v51 = vld [vmem:[%s2467_s3 + $0x8] sm:$0x1] }
  0x44   : > { %1416 = vmatmul.msk.bf16.gmra.mxu3 %vm395_vm1, %v389_v52  ;;  %2493 = vst [vmem:[#allocation6_spill] sm:$0xff] %v1678_v51  ;;  %v1683_v52 = vld [vmem:[%s2468_s4] sm:$0x1] }
  0x45   : > { %2494 = vst [vmem:[#allocation7_spill] sm:$0xff] %v1683_v52 }
  0x8f   : > { %v457_v54 = vpop.f32.mrf.mxu0  ;;  %v477_v56 = vpop.f32.mrf.mxu1 }
  0x90   : > { %v458_v55 = vadd.f32 %v1630_v53, %v457_v54  ;;  %v478_v57 = vadd.f32 %v1630_v53, %v477_v56  ;;  %v1689_v54 = vld [vmem:[%s2469_s5] sm:$0xf]  ;;  %v1697_v56 = vsel %vm612_vm3, 1.0, %v1488_v28 }
  0x91   : > { %2495 = vst [vmem:[#allocation8_spill] sm:$0xff] %v1689_v54 }
  0x92   : > { %v537_v58 = vmax.f32 %v458_v55, 0.0  ;;  %v545_v59 = vmax.f32 %v478_v57, 0.0  ;;  %v1694_v55 = vld [vmem:[%s2469_s5] sm:$0xf0] }
  0x93   : > { %2496 = vst [vmem:[#allocation9_spill] sm:$0xff] %v1694_v55 }
  0x94   : > { %570 = vst.msk [vmem:[#allocation2 + $0x10] sm:$0xff] %vm336_vm2, %v537_v58  ;;  %v1703_v58 = vld [vmem:[%s2469_s5 + $0x8] sm:$0xf] }
  0x95   : > { %578 = vst.msk [vmem:[#allocation2 + $0x50] sm:$0xff] %vm336_vm2, %v545_v59  ;;  %v1708_v59 = vld [vmem:[%s2470_s6] sm:$0x1] }
  0x96   : > { %v497_v60 = vpop.f32.mrf.mxu2  ;;  %2497 = vst [vmem:[#allocation10_spill] sm:$0xff] %v1703_v58 }
  0x97   : > { %v498_v61 = vadd.f32 %v1630_v53, %v497_v60  ;;  %v517_v62 = vpop.f32.mrf.mxu3  ;;  %v459_v63 = vpop.f32.mrf.mxu0  ;;  %2498 = vst [vmem:[#allocation11_spill] sm:$0xff] %v1708_v59  ;;  %v1711_v60 = vsel %vm619_vm4, 1.0, %v1488_v28 }
  0x98   : > { %v518_v2 = vadd.f32 %v1630_v53, %v517_v62  ;;  %v460_v3 = vadd.f32 %v1630_v53, %v459_v63  ;;  %v479_v4 = vpop.f32.mrf.mxu1 }
  0x99   : > { %v553_v5 = vmax.f32 %v498_v61, 0.0  ;;  %v480_v6 = vadd.f32 %v1630_v53, %v479_v4 }
  0x9a   : > { %v561_v7 = vmax.f32 %v518_v2, 0.0  ;;  %v538_v8 = vmax.f32 %v460_v3, 0.0 }
  0x9b   : > { %586 = vst.msk [vmem:[#allocation2 + $0x90] sm:$0xff] %vm336_vm2, %v553_v5  ;;  %v546_v9 = vmax.f32 %v480_v6, 0.0 }
  0x9c   : > { %594 = vst.msk [vmem:[#allocation2 + $0xd0] sm:$0xff] %vm336_vm2, %v561_v7 }
  0x9d   : > { %571 = vst.msk [vmem:[#allocation2 + $0x18] sm:$0xff] %vm336_vm2, %v538_v8 }
  0x9e   : > { %579 = vst.msk [vmem:[#allocation2 + $0x58] sm:$0xff] %vm336_vm2, %v546_v9  ;;  %v499_v10 = vpop.f32.mrf.mxu2 }
  0x9f   : > { %v500_v11 = vadd.f32 %v1630_v53, %v499_v10  ;;  %v519_v12 = vpop.f32.mrf.mxu3  ;;  %v462_v13 = vpop.f32.mrf.mxu0 }
  0xa0   : > { %v520_v14 = vadd.f32 %v1630_v53, %v519_v12  ;;  %v463_v15 = vadd.f32 %v1630_v53, %v462_v13  ;;  %v482_v16 = vpop.f32.mrf.mxu1 }
  0xa1   : > { %v554_v17 = vmax.f32 %v500_v11, 0.0  ;;  %v483_v18 = vadd.f32 %v1630_v53, %v482_v16 }
  0xa2   : > { %v562_v19 = vmax.f32 %v520_v14, 0.0  ;;  %v539_v20 = vmax.f32 %v463_v15, 0.0 }
  0xa3   : > { %587 = vst.msk [vmem:[#allocation2 + $0x98] sm:$0xff] %vm336_vm2, %v554_v17  ;;  %v547_v21 = vmax.f32 %v483_v18, 0.0 }
  0xa4   : > { %595 = vst.msk [vmem:[#allocation2 + $0xd8] sm:$0xff] %vm336_vm2, %v562_v19 }
  0xa5   : > { %572 = vst.msk [vmem:[#allocation2 + $0x20] sm:$0xff] %vm336_vm2, %v539_v20 }
  0xa6   : > { %580 = vst.msk [vmem:[#allocation2 + $0x60] sm:$0xff] %vm336_vm2, %v547_v21  ;;  %v502_v22 = vpop.f32.mrf.mxu2 }
  0xa7   : > { %v503_v23 = vadd.f32 %v1630_v53, %v502_v22  ;;  %v522_v24 = vpop.f32.mrf.mxu3  ;;  %v464_v25 = vpop.f32.mrf.mxu0 }
  0xa8   : > { %v523_v26 = vadd.f32 %v1630_v53, %v522_v24  ;;  %v465_v27 = vadd.f32 %v1630_v53, %v464_v25  ;;  %v484_v29 = vpop.f32.mrf.mxu1 }
  0xa9   : > { %v555_v30 = vmax.f32 %v503_v23, 0.0  ;;  %v485_v31 = vadd.f32 %v1630_v53, %v484_v29 }
  0xaa   : > { %v563_v32 = vmax.f32 %v523_v26, 0.0  ;;  %v540_v33 = vmax.f32 %v465_v27, 0.0 }
  0xab   : > { %588 = vst.msk [vmem:[#allocation2 + $0xa0] sm:$0xff] %vm336_vm2, %v555_v30  ;;  %v548_v34 = vmax.f32 %v485_v31, 0.0 }
  0xac   : > { %596 = vst.msk [vmem:[#allocation2 + $0xe0] sm:$0xff] %vm336_vm2, %v563_v32 }
  0xad   : > { %573 = vst.msk [vmem:[#allocation2 + $0x28] sm:$0xff] %vm336_vm2, %v540_v33 }
  0xae   : > { %581 = vst.msk [vmem:[#allocation2 + $0x68] sm:$0xff] %vm336_vm2, %v548_v34  ;;  %v504_v36 = vpop.f32.mrf.mxu2 }
  0xaf   : > { %v505_v37 = vadd.f32 %v1630_v53, %v504_v36  ;;  %v524_v38 = vpop.f32.mrf.mxu3  ;;  %v467_v39 = vpop.f32.mrf.mxu0 }
  0xb0   : > { %v525_v41 = vadd.f32 %v1630_v53, %v524_v38  ;;  %v468_v42 = vadd.f32 %v1630_v53, %v467_v39  ;;  %v487_v43 = vpop.f32.mrf.mxu1 }
  0xb1   : > { %v556_v44 = vmax.f32 %v505_v37, 0.0  ;;  %v488_v45 = vadd.f32 %v1630_v53, %v487_v43 }
  0xb2   : > { %v564_v47 = vmax.f32 %v525_v41, 0.0  ;;  %v541_v48 = vmax.f32 %v468_v42, 0.0 }
  0xb3   : > { %589 = vst.msk [vmem:[#allocation2 + $0xa8] sm:$0xff] %vm336_vm2, %v556_v44  ;;  %v549_v49 = vmax.f32 %v488_v45, 0.0 }
  0xb4   : > { %597 = vst.msk [vmem:[#allocation2 + $0xe8] sm:$0xff] %vm336_vm2, %v564_v47 }
  0xb5   : > { %574 = vst.msk [vmem:[#allocation2 + $0x30] sm:$0xff] %vm336_vm2, %v541_v48 }
  0xb6   : > { %582 = vst.msk [vmem:[#allocation2 + $0x70] sm:$0xff] %vm336_vm2, %v549_v49  ;;  %v507_v57 = vpop.f32.mrf.mxu2 }
  0xb7   : > { %v508_v61 = vadd.f32 %v1630_v53, %v507_v57  ;;  %v527_v62 = vpop.f32.mrf.mxu3  ;;  %v469_v63 = vpop.f32.mrf.mxu0 }
  0xb8   : > { %v528_v2 = vadd.f32 %v1630_v53, %v527_v62  ;;  %v470_v3 = vadd.f32 %v1630_v53, %v469_v63  ;;  %v489_v4 = vpop.f32.mrf.mxu1 }
  0xb9   : > { %v557_v5 = vmax.f32 %v508_v61, 0.0  ;;  %v490_v6 = vadd.f32 %v1630_v53, %v489_v4 }
  0xba   : > { %v565_v7 = vmax.f32 %v528_v2, 0.0  ;;  %v542_v8 = vmax.f32 %v470_v3, 0.0 }
  0xbb   : > { %590 = vst.msk [vmem:[#allocation2 + $0xb0] sm:$0xff] %vm336_vm2, %v557_v5  ;;  %v550_v9 = vmax.f32 %v490_v6, 0.0 }
  0xbc   : > { %598 = vst.msk [vmem:[#allocation2 + $0xf0] sm:$0xff] %vm336_vm2, %v565_v7 }
  0xbd   : > { %575 = vst.msk [vmem:[#allocation2 + $0x38] sm:$0xff] %vm336_vm2, %v542_v8 }
  0xbe   : > { %583 = vst.msk [vmem:[#allocation2 + $0x78] sm:$0xff] %vm336_vm2, %v550_v9  ;;  %v509_v28 = vpop.f32.mrf.mxu2 }
  0xbf   : > { %v510_v10 = vadd.f32 %v1630_v53, %v509_v28  ;;  %v529_v11 = vpop.f32.mrf.mxu3  ;;  %v472_v12 = vpop.f32.mrf.mxu0 }
  0xc0   : > { %v530_v13 = vadd.f32 %v1630_v53, %v529_v11  ;;  %v473_v14 = vadd.f32 %v1630_v53, %v472_v12  ;;  %v492_v15 = vpop.f32.mrf.mxu1 }
  0xc1   : > { %v558_v16 = vmax.f32 %v510_v10, 0.0  ;;  %v493_v17 = vadd.f32 %v1630_v53, %v492_v15 }
  0xc2   : > { %v566_v18 = vmax.f32 %v530_v13, 0.0  ;;  %v543_v19 = vmax.f32 %v473_v14, 0.0 }
  0xc3   : > { %591 = vst.msk [vmem:[#allocation2 + $0xb8] sm:$0xff] %vm336_vm2, %v558_v16  ;;  %v551_v20 = vmax.f32 %v493_v17, 0.0 }
  0xc4   : > { %599 = vst.msk [vmem:[#allocation2 + $0xf8] sm:$0xff] %vm336_vm2, %v566_v18 }
  0xc5   : > { %576 = vst.msk [vmem:[#allocation2 + $0x40] sm:$0xff] %vm336_vm2, %v543_v19 }
  0xc6   : > { %584 = vst.msk [vmem:[#allocation2 + $0x80] sm:$0xff] %vm336_vm2, %v551_v20  ;;  %v512_v21 = vpop.f32.mrf.mxu2 }
  0xc7   : > { %v513_v22 = vadd.f32 %v1630_v53, %v512_v21  ;;  %v532_v23 = vpop.f32.mrf.mxu3  ;;  %v474_v24 = vpop.f32.mrf.mxu0 }
  0xc8   : > { %v533_v25 = vadd.f32 %v1630_v53, %v532_v23  ;;  %v475_v26 = vadd.f32 %v1630_v53, %v474_v24  ;;  %v494_v27 = vpop.f32.mrf.mxu1 }
  0xc9   : > { %v559_v29 = vmax.f32 %v513_v22, 0.0  ;;  %v495_v30 = vadd.f32 %v1630_v53, %v494_v27 }
  0xca   : > { %v567_v31 = vmax.f32 %v533_v25, 0.0  ;;  %v544_v32 = vmax.f32 %v475_v26, 0.0 }
  0xcb   : > { %592 = vst.msk [vmem:[#allocation2 + $0xc0] sm:$0xff] %vm336_vm2, %v559_v29  ;;  %v552_v33 = vmax.f32 %v495_v30, 0.0 }
  0xcc   : > { %600 = vst.msk [vmem:[#allocation2 + $0x100] sm:$0xff] %vm336_vm2, %v567_v31 }
  0xcd   : > { %577 = vst.msk [vmem:[#allocation2 + $0x48] sm:$0xff] %vm336_vm2, %v544_v32 }
  0xce   : > { %585 = vst.msk [vmem:[#allocation2 + $0x88] sm:$0xff] %vm336_vm2, %v552_v33  ;;  %v514_v34 = vpop.f32.mrf.mxu2 }
  0xcf   : > { %v515_v35 = vadd.f32 %v1630_v53, %v514_v34  ;;  %v534_v36 = vpop.f32.mrf.mxu3 }
  0xd0   : > { %v535_v37 = vadd.f32 %v1630_v53, %v534_v36 }
  0xd1   : > { %v560_v38 = vmax.f32 %v515_v35, 0.0 }
  0xd2   : > { %v568_v39 = vmax.f32 %v535_v37, 0.0 }
  0xd3   : > { %593 = vst.msk [vmem:[#allocation2 + $0xc8] sm:$0xff] %vm336_vm2, %v560_v38 }
  0xd4   : > { %601 = vst.msk [vmem:[#allocation2 + $0x108] sm:$0xff] %vm336_vm2, %v568_v39 }
  0xd5 LB: >> { %v2499_v50 = vld [vmem:[#allocation5_spill] sm:$0xff]  ;;  %v2500_v0 = vld [vmem:[#allocation3_spill] sm:$0xff]  ;;  %v2501_v58 = vld [vmem:[#allocation10_spill] sm:$0xff]  ;;  %s1750_s22 = sshll.u32 %s1486_s21, 7  ;;  %vm756_vm5 = vcmp.lt.s32.totalorder %v1661_v40, 1  ;;  %vm916_vm6 = vcmp.lt.s32.totalorder %v1661_v40, 7  ;;  %s1486_s21 = sphi %s1741_s21, %s629_s21  }
  0xd6   : >> { %v1241_v41 = vsel %vm444_vm0, %v2500_v0, 0  ;;  %v1107_v53 = vunpack.c.l.b16 %v2501_v58  ;;  %v1753_v43 = vperm.slane %v2499_v50, 1  ;;  %v1756_v44 = vperm.slane %v2499_v50, 4  ;;  %s1760_s24 = scalar_lea.vmem %s1564_s20, %s1750_s22  ;;  %v2502_v54 = vld [vmem:[#allocation8_spill] sm:$0xff]  ;;  %v2503_v55 = vld [vmem:[#allocation9_spill] sm:$0xff]  ;;  %s1790_s25 = scalar_lea.vmem [#allocation2], %s1750_s22 }
  0xd7   : >> { %1250 = vmatpush.bf16.msra.mxu1 %v1241_v41  ;;  %1453 = vmatpush.bf16.msra.mxu3 %v1241_v41  ;;  %v1763_v45 = vperm.slane %v2499_v50, 7  ;;  %v1767_v46 = vperm.slane %v2499_v50, 0  ;;  %v1770_v47 = vperm.slane %v2499_v50, 3  ;;  %v1189_v48 = vld [vmem:[%s1760_s24] sm:$0xff]  ;;  %v1190_v49 = vld [vmem:[%s1760_s24 + $0x8] sm:$0xff]  ;;  %v1776_v61 = vld [vmem:[%s1760_s24 + $0x10] sm:$0xff]  ;;  %v1424_v62 = vor.u32 %v2503_v55, %v2502_v54  ;;  %s2394_s26 = scalar_lea.vmem %s1569_s23, %s1750_s22 }
  0xd8   : >> { %v1109_v42 = vpack.c.b16 %v1107_v53, %v1107_v53  ;;  %v1781_v63 = vperm.slane %v2499_v50, 6  ;;  %v1784_v2 = vperm.slane %v2499_v50, 2  ;;  %v1205_v3 = vpack.c.bf16 %v1190_v49, %v1189_v48  ;;  %v1787_v4 = vld [vmem:[%s1760_s24 + $0x18] sm:$0xff]  ;;  %v2505_v52 = vld [vmem:[#allocation7_spill] sm:$0xff]  ;;  %s629_s21 = sadd.s32 1, %s1486_s21  }
  0xd9   : >> { %v1799_v7 = vperm.slane %v2499_v50, 5  ;;  %v2504_v51 = vld [vmem:[#allocation6_spill] sm:$0xff]  ;;  %v1805_v9 = vperm.slane %v2505_v52, 0  ;;  %v1206_v28 = vpack.c.bf16 %v1787_v4, %v1776_v61  ;;  %vm1309_vm7 = vcmask 130048   ;;  %p626_p4 = scmp.ge.s32.totalorder %s629_s21, 2  }
  0xda   : >> { %v1136_v57 = vsel %vm444_vm0, %v1109_v42, 0  ;;  %v1802_v8 = vperm.slane %v2504_v51, 0  ;;  %1434 = vmatmul.msk.bf16.vlgmr.msra.gmra.mxu1 %vm395_vm1, %v1205_v3 }
  0xdb   : >> { %1144 = vmatpush.bf16.msra.mxu0 %v1136_v57  ;;  %1451 = vmatpush.bf16.msra.mxu2 %v1136_v57  ;;  %v1793_v5 = vld [vmem:[%s1790_s25] sm:$0xff]  ;;  %v1796_v6 = vld [vmem:[%s1790_s25 + $0x8] sm:$0xff]  ;;  %v1810_v10 = vld [vmem:[%s1790_s25 + $0x10] sm:$0xff] }
  0xdc   : >> { %v1813_v11 = vld [vmem:[%s1790_s25 + $0x18] sm:$0xff]  ;;  %v1816_v12 = vld [vmem:[%s1790_s25 + $0x20] sm:$0xff]  ;;  %v654_v13 = vmul.f32 %v1753_v43, %v1793_v5  ;;  %v655_v14 = vmul.f32 %v1753_v43, %v1796_v6  ;;  %v736_v15 = vrot.slane %v1793_v5, 7  ;;  %v1826_v16 = vld [vmem:[%s1790_s25 + $0x28] sm:$0xff]  ;;  %v671_v17 = vmul.f32 %v1756_v44, %v1810_v10 }
  0xdd   : >> { %v672_v18 = vmul.f32 %v1756_v44, %v1813_v11  ;;  %v704_v19 = vmul.f32 %v1763_v45, %v1816_v12  ;;  %v737_v20 = vrot.slane %v1810_v10, 7  ;;  %v705_v21 = vmul.f32 %v1763_v45, %v1826_v16  ;;  %v1867_v42 = vld [vmem:[%s1790_s25 + $0x40] sm:$0xff]  ;;  %v1876_v3 = vld [vmem:[%s1790_s25 + $0x48] sm:$0xff] }
  0xde   : >> { %v738_v22 = vrot.slane %v1816_v12, 7  ;;  %v746_v23 = vrot.slane %v1796_v6, 7  ;;  %v747_v24 = vrot.slane %v1813_v11, 7  ;;  %v687_v25 = vadd.f32 %v671_v17, %v654_v13 }
  0xdf   : >> { %1145 = vmatpush.bf16.msra.mxu0 %v1424_v62  ;;  %1452 = vmatpush.bf16.msra.mxu2 %v1424_v62  ;;  %v688_v26 = vadd.f32 %v672_v18, %v655_v14  ;;  %v748_v27 = vrot.slane %v1826_v16, 7  ;;  %v896_v29 = vrot.slane %v1793_v5, 1  ;;  %v897_v57 = vrot.slane %v1810_v10, 1  ;;  %v1879_v5 = vld [vmem:[%s1790_s25 + $0x50] sm:$0xff] }
  0xe0   : >> { %v757_v30 = vsel %vm756_vm5, %v736_v15, %v746_v23  ;;  %v1846_v31 = vsel %vm756_vm5, %v737_v20, %v747_v24  ;;  %v767_v32 = vsel %vm756_vm5, %v746_v23, %v736_v15  ;;  %v768_v33 = vsel %vm756_vm5, %v747_v24, %v737_v20 }
  0xe1   : >> { %v720_v34 = vadd.f32 %v704_v19, %v687_v25  ;;  %v721_v35 = vadd.f32 %v705_v21, %v688_v26  ;;  %v1854_v36 = vsel %vm756_vm5, %v738_v22, %v748_v27  ;;  %v769_v37 = vsel %vm756_vm5, %v748_v27, %v738_v22 }
  0xe2   : >> { %v777_v38 = vmul.f32 %v1697_v56, %v767_v32  ;;  %v1860_v39 = vmul.f32 %v1697_v56, %v768_v33  ;;  %v1863_v41 = vmul.f32 %v1697_v56, %v769_v37  ;;  %v799_v53 = vmul.f32 %v1767_v46, %v757_v30  ;;  %v1908_v32 = vld [vmem:[%s1790_s25 + $0x58] sm:$0xff] }
  0xe3   : >> { %v832_v48 = vmul.f32 %v1770_v47, %v1846_v31  ;;  %v865_v49 = vmul.f32 %v1781_v63, %v1854_v36  ;;  %v898_v62 = vrot.slane %v1816_v12, 1  ;;  %v906_v18 = vrot.slane %v1796_v6, 1  ;;  %2506 = vst [vmem:[#allocation12_spill] sm:$0xff] %v1908_v32 }
  0xe4   : >> { %v798_v13 = vmul.f32 %v1767_v46, %v777_v38  ;;  %v815_v14 = vadd.f32 %v799_v53, %v721_v35  ;;  %v831_v15 = vmul.f32 %v1770_v47, %v1860_v39  ;;  %v864_v17 = vmul.f32 %v1781_v63, %v1863_v41 }
  0xe5   : >> { %v907_v19 = vrot.slane %v1813_v11, 1  ;;  %v908_v20 = vrot.slane %v1826_v16, 1  ;;  %v662_v21 = vmul.f32 %v1753_v43, %v1867_v42  ;;  %v663_v24 = vmul.f32 %v1753_v43, %v1876_v3 }
  0xe6   : >> { %v814_v22 = vadd.f32 %v798_v13, %v720_v34  ;;  %v848_v23 = vadd.f32 %v832_v48, %v815_v14  ;;  %v679_v25 = vmul.f32 %v1756_v44, %v1879_v5  ;;  %v917_v6 = vsel %vm916_vm6, %v896_v29, %v906_v18  ;;  %v1923_v13 = vld [vmem:[%s1790_s25 + $0x60] sm:$0xff]  ;;  %v1926_v14 = vld [vmem:[%s1790_s25 + $0x68] sm:$0xff] }
  0xe7   : >> { %v1899_v26 = vsel %vm916_vm6, %v897_v57, %v907_v19  ;;  %v1903_v27 = vsel %vm916_vm6, %v898_v62, %v908_v20  ;;  %v927_v30 = vsel %vm916_vm6, %v906_v18, %v896_v29  ;;  %v928_v35 = vsel %vm916_vm6, %v907_v19, %v897_v57 }
  0xe8   : >> { %v847_v33 = vadd.f32 %v831_v15, %v814_v22  ;;  %v881_v34 = vadd.f32 %v865_v49, %v848_v23  ;;  %v929_v37 = vsel %vm916_vm6, %v908_v20, %v898_v62  ;;  %v938_v38 = vmul.f32 %v1711_v60, %v927_v30 }
  0xe9   : >> { %v1916_v53 = vmul.f32 %v1711_v60, %v928_v35  ;;  %v1919_v48 = vmul.f32 %v1711_v60, %v929_v37  ;;  %v958_v29 = vmul.f32 %v1784_v2, %v917_v6  ;;  %v991_v57 = vmul.f32 %v1799_v7, %v1899_v26 }
  0xea   : >> { %v880_v49 = vadd.f32 %v864_v17, %v847_v33  ;;  %v1024_v62 = vmul.f32 %v1802_v8, %v1903_v27  ;;  %v680_v15 = vmul.f32 %v1756_v44, %v1908_v32  ;;  %v959_v18 = vmul.f32 %v1784_v2, %v938_v38  ;;  %1435 = vmatmul.msk.bf16.gmra.mxu1 %vm395_vm1, %v1206_v28 }
  0xeb   : >> { %v992_v19 = vmul.f32 %v1799_v7, %v1916_v53  ;;  %v1025_v20 = vmul.f32 %v1802_v8, %v1919_v48  ;;  %v695_v22 = vadd.f32 %v679_v25, %v662_v21  ;;  %v712_v6 = vmul.f32 %v1763_v45, %v1923_v13 }
  0xec   : >> { %v974_v23 = vadd.f32 %v958_v29, %v880_v49  ;;  %v696_v17 = vadd.f32 %v680_v15, %v663_v24  ;;  %v713_v30 = vmul.f32 %v1763_v45, %v1926_v14  ;;  %v975_v33 = vadd.f32 %v959_v18, %v881_v34 }
  0xed   : >> { %v740_v35 = vrot.slane %v1867_v42, 7  ;;  %v741_v37 = vrot.slane %v1879_v5, 7  ;;  %v742_v21 = vrot.slane %v1923_v13, 7  ;;  %v728_v24 = vadd.f32 %v712_v6, %v695_v22 }
  0xee   : >> { %v1007_v25 = vadd.f32 %v991_v57, %v974_v23  ;;  %v729_v38 = vadd.f32 %v713_v30, %v696_v17  ;;  %v750_v29 = vrot.slane %v1876_v3, 7  ;;  %v1008_v49 = vadd.f32 %v992_v19, %v975_v33 }
  0xef   : >> { %v751_v15 = vrot.slane %v1908_v32, 7  ;;  %v752_v0 = vrot.slane %v1926_v14, 7  ;;  %v900_v61 = vrot.slane %v1867_v42, 1  ;;  %v901_v57 = vrot.slane %v1879_v5, 1 }
  0xf0   : >> { %v1040_v4 = vadd.f32 %v1024_v62, %v1007_v25  ;;  %v1956_v28 = vsel %vm756_vm5, %v740_v35, %v750_v29  ;;  %v771_v34 = vsel %vm756_vm5, %v750_v29, %v740_v35  ;;  %v1041_v18 = vadd.f32 %v1025_v20, %v1008_v49  ;;  %v1199_v25 = vld [vmem:[%s1760_s24 + $0x50] sm:$0xff] }
  0xf1   : >> { %2507 = vst [vmem:[#allocation13_spill] sm:$0xff] %v1956_v28  ;;  %v1963_v19 = vsel %vm756_vm5, %v741_v37, %v751_v15  ;;  %v1967_v22 = vsel %vm756_vm5, %v742_v21, %v752_v0  ;;  %v772_v62 = vsel %vm756_vm5, %v751_v15, %v741_v37  ;;  %v773_v17 = vsel %vm756_vm5, %v752_v0, %v742_v21  ;;  %v1200_v15 = vld [vmem:[%s1760_s24 + $0x58] sm:$0xff] }
  0xf2   : >> { %v1059_v23 = vadd.f32 %v1805_v9, %v1040_v4  ;;  %v1975_v20 = vmul.f32 %v1697_v56, %v771_v34  ;;  %v1978_v6 = vmul.f32 %v1697_v56, %v772_v62  ;;  %v1060_v30 = vadd.f32 %v1805_v9, %v1041_v18  ;;  %v1193_v4 = vld [vmem:[%s1760_s24 + $0x20] sm:$0xff]  ;;  %v1194_v34 = vld [vmem:[%s1760_s24 + $0x28] sm:$0xff] }
  0xf3   : >> { %v1982_v33 = vmul.f32 %v1697_v56, %v773_v17  ;;  %v807_v35 = vmul.f32 %v1767_v46, %v1956_v28  ;;  %v840_v37 = vmul.f32 %v1770_v47, %v1963_v19  ;;  %v873_v49 = vmul.f32 %v1781_v63, %v1967_v22 }
  0xf4   : >> { %2508 = vst [vmem:[#allocation14_spill] sm:$0xff] %v1975_v20  ;;  %v1075_v29 = vmax.f32 %v1059_v23, 0.0  ;;  %v806_v0 = vmul.f32 %v1767_v46, %v1975_v20  ;;  %v839_v21 = vmul.f32 %v1770_v47, %v1978_v6  ;;  %v1076_v18 = vmax.f32 %v1060_v30, 0.0 }
  0xf5   : >> { %v823_v62 = vadd.f32 %v807_v35, %v729_v38  ;;  %v872_v17 = vmul.f32 %v1781_v63, %v1982_v33  ;;  %v902_v50 = vrot.slane %v1923_v13, 1  ;;  %v910_v51 = vrot.slane %v1876_v3, 1 }
  0xf6   : >> { %v822_v23 = vadd.f32 %v806_v0, %v728_v24  ;;  %v911_v52 = vrot.slane %v1908_v32, 1  ;;  %v912_v54 = vrot.slane %v1926_v14, 1  ;;  %v1091_v55 = vpack.c.bf16 %v1076_v18, %v1075_v29 }
  0xf7   : >> { %v856_v58 = vadd.f32 %v840_v37, %v823_v62  ;;  %v1210_v59 = vpack.c.bf16 %v1200_v15, %v1199_v25  ;;  %v1207_v1 = vpack.c.bf16 %v1194_v34, %v1193_v4  ;;  %v2006_v38 = vsel %vm916_vm6, %v900_v61, %v910_v51 }
  0xf8   : >> { %v855_v28 = vadd.f32 %v839_v21, %v822_v23  ;;  %2509 = vst [vmem:[#allocation15_spill] sm:$0xff] %v2006_v38  ;;  %v2010_v30 = vsel %vm916_vm6, %v901_v57, %v911_v52  ;;  %v2014_v24 = vsel %vm916_vm6, %v902_v50, %v912_v54  ;;  %1425 = vmatmul.msk.bf16.vlgmr.msra.gmra.mxu0 %vm336_vm2, %v1091_v55  ;;  %v2034_v55 = vld [vmem:[%s1790_s25 + $0x30] sm:$0xff] }
  0xf9   : >> { %2510 = vst [vmem:[#allocation16_spill] sm:$0xff] %v2010_v30  ;;  %v889_v35 = vadd.f32 %v873_v49, %v856_v58  ;;  %v931_v37 = vsel %vm916_vm6, %v910_v51, %v900_v61  ;;  %v932_v25 = vsel %vm916_vm6, %v911_v52, %v901_v57  ;;  %v933_v29 = vsel %vm916_vm6, %v912_v54, %v902_v50  ;;  %v2043_v54 = vld [vmem:[%s1790_s25 + $0x38] sm:$0xff] }
  0xfa   : >> { %v888_v0 = vadd.f32 %v872_v17, %v855_v28  ;;  %v2024_v21 = vmul.f32 %v1711_v60, %v931_v37  ;;  %v2027_v15 = vmul.f32 %v1711_v60, %v932_v25  ;;  %v2030_v4 = vmul.f32 %v1711_v60, %v933_v29  ;;  %1439 = vmatmul.msk.bf16.vlgmr.msra.gmra.mxu3 %vm395_vm1, %v1210_v59 }
  0xfb   : >> { %v966_v51 = vmul.f32 %v1784_v2, %v2006_v38  ;;  %v999_v50 = vmul.f32 %v1799_v7, %v2010_v30  ;;  %v1032_v52 = vmul.f32 %v1802_v8, %v2014_v24  ;;  %v656_v58 = vmul.f32 %v1753_v43, %v1810_v10  ;;  %1436 = vmatmul.msk.bf16.gmra.mxu1 %vm395_vm1, %v1207_v1 }
  0xfc   : >> { %2511 = vst [vmem:[#allocation17_spill] sm:$0xff] %v2024_v21  ;;  %v967_v61 = vmul.f32 %v1784_v2, %v2024_v21  ;;  %v1000_v59 = vmul.f32 %v1799_v7, %v2027_v15  ;;  %v1033_v28 = vmul.f32 %v1802_v8, %v2030_v4  ;;  %v657_v57 = vmul.f32 %v1753_v43, %v1813_v11 }
  0xfd   : >> { %2512 = vst [vmem:[#allocation18_spill] sm:$0xff] %v2027_v15  ;;  %v982_v49 = vadd.f32 %v966_v51, %v888_v0  ;;  %v673_v34 = vmul.f32 %v1756_v44, %v1816_v12  ;;  %v674_v10 = vmul.f32 %v1756_v44, %v1826_v16  ;;  %v706_v18 = vmul.f32 %v1763_v45, %v2034_v55 }
  0xfe   : >> { %v983_v62 = vadd.f32 %v967_v61, %v889_v35  ;;  %v707_v17 = vmul.f32 %v1763_v45, %v2043_v54  ;;  %v739_v23 = vrot.slane %v2034_v55, 7  ;;  %v749_v11 = vrot.slane %v2043_v54, 7 }
  0xff   : >> { %v1015_v37 = vadd.f32 %v999_v50, %v982_v49  ;;  %v689_v25 = vadd.f32 %v673_v34, %v656_v58  ;;  %v690_v1 = vadd.f32 %v674_v10, %v657_v57  ;;  %v800_v29 = vmul.f32 %v1767_v46, %v1860_v39 }
 0x100   : >> { %v1016_v0 = vadd.f32 %v1000_v59, %v983_v62  ;;  %v2070_v51 = vsel %vm756_vm5, %v739_v23, %v749_v11  ;;  %v770_v35 = vsel %vm756_vm5, %v749_v11, %v739_v23  ;;  %v801_v61 = vmul.f32 %v1767_v46, %v1846_v31 }
 0x101   : >> { %v1048_v21 = vadd.f32 %v1032_v52, %v1015_v37  ;;  %v722_v38 = vadd.f32 %v706_v18, %v689_v25  ;;  %v723_v20 = vadd.f32 %v707_v17, %v690_v1  ;;  %v2077_v50 = vmul.f32 %v1697_v56, %v770_v35  ;;  %v2112_v35 = vld [vmem:[%s1790_s25 + $0x78] sm:$0xff] }
 0x102   : >> { %v1049_v58 = vadd.f32 %v1033_v28, %v1016_v0  ;;  %v833_v39 = vmul.f32 %v1770_v47, %v1863_v41  ;;  %v834_v59 = vmul.f32 %v1770_v47, %v1854_v36  ;;  %v867_v57 = vmul.f32 %v1781_v63, %v2070_v51  ;;  %2516 = vst [vmem:[#allocation22_spill] sm:$0xff] %v2112_v35 }
 0x103   : >> { %v1067_v49 = vadd.f32 %v1805_v9, %v1048_v21  ;;  %v816_v34 = vadd.f32 %v800_v29, %v722_v38  ;;  %v817_v31 = vadd.f32 %v801_v61, %v723_v20  ;;  %v866_v52 = vmul.f32 %v1781_v63, %v2077_v50 }
 0x104   : >> { %v1068_v10 = vadd.f32 %v1805_v9, %v1049_v58  ;;  %v899_v28 = vrot.slane %v2034_v55, 1  ;;  %v909_v18 = vrot.slane %v2043_v54, 1  ;;  %v960_v62 = vmul.f32 %v1784_v2, %v1899_v26 }
 0x105   : >> { %v1083_v17 = vmax.f32 %v1067_v49, 0.0  ;;  %v849_v23 = vadd.f32 %v833_v39, %v816_v34  ;;  %v850_v11 = vadd.f32 %v834_v59, %v817_v31  ;;  %v961_v20 = vmul.f32 %v1784_v2, %v1916_v53  ;;  %v2109_v53 = vld [vmem:[%s1790_s25 + $0x70] sm:$0xff] }
 0x106   : >> { %v1084_v38 = vmax.f32 %v1068_v10, 0.0  ;;  %v2097_v21 = vsel %vm916_vm6, %v899_v28, %v909_v18  ;;  %v930_v37 = vsel %vm916_vm6, %v909_v18, %v899_v28  ;;  %v993_v25 = vmul.f32 %v1799_v7, %v1903_v27  ;;  %2515 = vst [vmem:[#allocation21_spill] sm:$0xff] %v2109_v53 }
 0x107   : >> { %2513 = vst [vmem:[#allocation19_spill] sm:$0xff] %v2097_v21  ;;  %v882_v1 = vadd.f32 %v866_v52, %v849_v23  ;;  %v883_v29 = vadd.f32 %v867_v57, %v850_v11  ;;  %v2104_v26 = vmul.f32 %v1711_v60, %v930_v37  ;;  %v994_v0 = vmul.f32 %v1799_v7, %v1919_v48 }
 0x108   : >> { %v1095_v61 = vpack.c.bf16 %v1084_v38, %v1083_v17  ;;  %v1026_v58 = vmul.f32 %v1802_v8, %v2097_v21  ;;  %v664_v39 = vmul.f32 %v1753_v43, %v1879_v5  ;;  %v665_v59 = vmul.f32 %v1753_v43, %v1908_v32 }
 0x109   : >> { %2514 = vst [vmem:[#allocation20_spill] sm:$0xff] %v2104_v26  ;;  %v976_v57 = vadd.f32 %v960_v62, %v882_v1  ;;  %v977_v49 = vadd.f32 %v961_v20, %v883_v29  ;;  %v1027_v34 = vmul.f32 %v1802_v8, %v2104_v26  ;;  %v681_v31 = vmul.f32 %v1756_v44, %v1923_v13 }
 0x10a   : >> { %1429 = vmatmul.msk.bf16.vlgmr.msra.gmra.mxu2 %vm336_vm2, %v1095_v61  ;;  %v682_v52 = vmul.f32 %v1756_v44, %v1926_v14  ;;  %v714_v10 = vmul.f32 %v1763_v45, %v2109_v53  ;;  %v715_v28 = vmul.f32 %v1763_v45, %v2112_v35  ;;  %v743_v18 = vrot.slane %v2109_v53, 7 }
 0x10b   : >> { %v1009_v62 = vadd.f32 %v993_v25, %v976_v57  ;;  %v1010_v17 = vadd.f32 %v994_v0, %v977_v49  ;;  %v697_v23 = vadd.f32 %v681_v31, %v664_v39  ;;  %v753_v11 = vrot.slane %v2112_v35, 7 }
 0x10c   : >> { %v698_v20 = vadd.f32 %v682_v52, %v665_v59  ;;  %v808_v38 = vmul.f32 %v1767_v46, %v1978_v6  ;;  %v809_v37 = vmul.f32 %v1767_v46, %v1963_v19  ;;  %v841_v1 = vmul.f32 %v1770_v47, %v1982_v33 }
 0x10d   : >> { %v1042_v29 = vadd.f32 %v1026_v58, %v1009_v62  ;;  %v1043_v61 = vadd.f32 %v1027_v34, %v1010_v17  ;;  %v730_v32 = vadd.f32 %v714_v10, %v697_v23  ;;  %v2141_v25 = vsel %vm756_vm5, %v743_v18, %v753_v11 }
 0x10e   : >> { %v731_v0 = vadd.f32 %v715_v28, %v698_v20  ;;  %v774_v39 = vsel %vm756_vm5, %v753_v11, %v743_v18  ;;  %v842_v59 = vmul.f32 %v1770_v47, %v1967_v22  ;;  %v875_v57 = vmul.f32 %v1781_v63, %v2141_v25  ;;  %v1201_v20 = vld [vmem:[%s1760_s24 + $0x60] sm:$0xff] }
 0x10f   : >> { %v1061_v58 = vadd.f32 %v1805_v9, %v1042_v29  ;;  %v1062_v49 = vadd.f32 %v1805_v9, %v1043_v61  ;;  %v2152_v34 = vmul.f32 %v1697_v56, %v774_v39  ;;  %v824_v31 = vadd.f32 %v808_v38, %v730_v32  ;;  %v1202_v29 = vld [vmem:[%s1760_s24 + $0x68] sm:$0xff]  ;;  %v1196_v39 = vld [vmem:[%s1760_s24 + $0x38] sm:$0xff] }
 0x110   : >> { %v825_v52 = vadd.f32 %v809_v37, %v731_v0  ;;  %v903_v10 = vrot.slane %v2109_v53, 1  ;;  %v913_v28 = vrot.slane %v2112_v35, 1  ;;  %v968_v18 = vmul.f32 %v1784_v2, %v2010_v30  ;;  %v1195_v0 = vld [vmem:[%s1760_s24 + $0x30] sm:$0xff] }
 0x111   : >> { %v1077_v62 = vmax.f32 %v1061_v58, 0.0  ;;  %v1078_v17 = vmax.f32 %v1062_v49, 0.0  ;;  %v857_v23 = vadd.f32 %v841_v1, %v824_v31  ;;  %v874_v11 = vmul.f32 %v1781_v63, %v2152_v34 }
 0x112   : >> { %v858_v61 = vadd.f32 %v842_v59, %v825_v52  ;;  %v2164_v32 = vsel %vm916_vm6, %v903_v10, %v913_v28  ;;  %v934_v38 = vsel %vm916_vm6, %v913_v28, %v903_v10  ;;  %v969_v37 = vmul.f32 %v1784_v2, %v2027_v15 }
 0x113   : >> { %v1092_v58 = vpack.c.bf16 %v1078_v17, %v1077_v62  ;;  %v890_v1 = vadd.f32 %v874_v11, %v857_v23  ;;  %v2173_v49 = vmul.f32 %v1711_v60, %v934_v38  ;;  %v1001_v59 = vmul.f32 %v1799_v7, %v2014_v24 }
 0x114   : >> { %v891_v31 = vadd.f32 %v875_v57, %v858_v61  ;;  %v1002_v52 = vmul.f32 %v1799_v7, %v2030_v4  ;;  %v1034_v10 = vmul.f32 %v1802_v8, %v2164_v32  ;;  %v1211_v28 = vpack.c.bf16 %v1202_v29, %v1201_v20 }
 0x115   : >> { %1426 = vmatmul.msk.bf16.gmra.mxu0 %vm336_vm2, %v1092_v58  ;;  %v984_v15 = vadd.f32 %v968_v18, %v890_v1  ;;  %v1035_v62 = vmul.f32 %v1802_v8, %v2173_v49  ;;  %v1208_v17 = vpack.c.bf16 %v1196_v39, %v1195_v0  ;;  %v658_v23 = vmul.f32 %v1753_v43, %v1816_v12 }
 0x116   : >> { %v985_v11 = vadd.f32 %v969_v37, %v891_v31  ;;  %1440 = vmatmul.msk.bf16.gmra.mxu3 %vm395_vm1, %v1211_v28  ;;  %v659_v57 = vmul.f32 %v1753_v43, %v1826_v16  ;;  %v675_v61 = vmul.f32 %v1756_v44, %v2034_v55  ;;  %v676_v20 = vmul.f32 %v1756_v44, %v2043_v54 }
 0x117   : >> { %v1017_v18 = vadd.f32 %v1001_v59, %v984_v15  ;;  %1437 = vmatmul.msk.bf16.gmra.mxu1 %vm395_vm1, %v1208_v17  ;;  %v708_v29 = vmul.f32 %v1763_v45, %v1867_v42  ;;  %v709_v12 = vmul.f32 %v1763_v45, %v1876_v3  ;;  %v802_v38 = vmul.f32 %v1767_v46, %v1863_v41  ;;  %v2517_v59 = vld [vmem:[#allocation14_spill] sm:$0xff] }
 0x118   : >> { %v1018_v37 = vadd.f32 %v1002_v52, %v985_v11  ;;  %v691_v16 = vadd.f32 %v675_v61, %v658_v23  ;;  %v692_v0 = vadd.f32 %v676_v20, %v659_v57  ;;  %v803_v39 = vmul.f32 %v1767_v46, %v1854_v36  ;;  %v2518_v52 = vld [vmem:[#allocation13_spill] sm:$0xff] }
 0x119   : >> { %v1050_v58 = vadd.f32 %v1034_v10, %v1017_v18  ;;  %v835_v15 = vmul.f32 %v1770_v47, %v2077_v50  ;;  %v836_v1 = vmul.f32 %v1770_v47, %v2070_v51  ;;  %v868_v31 = vmul.f32 %v1781_v63, %v2517_v59 }
 0x11a   : >> { %v1051_v28 = vadd.f32 %v1035_v62, %v1018_v37  ;;  %v724_v17 = vadd.f32 %v708_v29, %v691_v16  ;;  %v725_v41 = vadd.f32 %v709_v12, %v692_v0  ;;  %v869_v23 = vmul.f32 %v1781_v63, %v2518_v52  ;;  %v2519_v12 = vld [vmem:[#allocation15_spill] sm:$0xff]  ;;  %v2520_v16 = vld [vmem:[#allocation17_spill] sm:$0xff] }
 0x11b   : >> { %v1069_v11 = vadd.f32 %v1805_v9, %v1050_v58  ;;  %v962_v36 = vmul.f32 %v1784_v2, %v1903_v27  ;;  %v963_v10 = vmul.f32 %v1784_v2, %v1919_v48  ;;  %v995_v57 = vmul.f32 %v1799_v7, %v2097_v21  ;;  %v649_v0 = vld [vmem:[%s1790_s25 + $0x80] sm:$0xff] }
 0x11c   : >> { %v1070_v61 = vadd.f32 %v1805_v9, %v1051_v28  ;;  %v818_v62 = vadd.f32 %v802_v38, %v724_v17  ;;  %v819_v20 = vadd.f32 %v803_v39, %v725_v41  ;;  %v996_v18 = vmul.f32 %v1799_v7, %v2104_v26  ;;  %v650_v28 = vld [vmem:[%s1790_s25 + $0x88] sm:$0xff] }
 0x11d   : >> { %v1085_v29 = vmax.f32 %v1069_v11, 0.0  ;;  %v1028_v37 = vmul.f32 %v1802_v8, %v2519_v12  ;;  %v1029_v27 = vmul.f32 %v1802_v8, %v2520_v16  ;;  %v666_v48 = vmul.f32 %v1753_v43, %v1923_v13 }
 0x11e   : >> { %v1086_v58 = vmax.f32 %v1070_v61, 0.0  ;;  %v851_v30 = vadd.f32 %v835_v15, %v818_v62  ;;  %v852_v21 = vadd.f32 %v836_v1, %v819_v20  ;;  %v667_v38 = vmul.f32 %v1753_v43, %v1926_v14 }
 0x11f   : >> { %v683_v39 = vmul.f32 %v1756_v44, %v2109_v53  ;;  %v684_v17 = vmul.f32 %v1756_v44, %v2112_v35  ;;  %v2235_v41 = vmul.f32 %v1756_v44, %v649_v0  ;;  %v2238_v11 = vmul.f32 %v1756_v44, %v650_v28 }
 0x120   : >> { %v1096_v13 = vpack.c.bf16 %v1086_v58, %v1085_v29  ;;  %v884_v61 = vadd.f32 %v868_v31, %v851_v30  ;;  %v885_v15 = vadd.f32 %v869_v23, %v852_v21  ;;  %v716_v1 = vmul.f32 %v1763_v45, %v649_v0 }
 0x121   : >> { %2521 = vst [vmem:[#allocation14_spill] sm:$0xff] %v2235_v41  ;;  %v699_v62 = vadd.f32 %v683_v39, %v666_v48  ;;  %v700_v20 = vadd.f32 %v684_v17, %v667_v38  ;;  %v717_v14 = vmul.f32 %v1763_v45, %v650_v28  ;;  %v744_v16 = vrot.slane %v649_v0, 7  ;;  %v1203_v17 = vld [vmem:[%s1760_s24 + $0x70] sm:$0xff] }
 0x122   : >> { %2522 = vst [vmem:[#allocation13_spill] sm:$0xff] %v2238_v11  ;;  %1430 = vmatmul.msk.bf16.gmra.mxu2 %vm336_vm2, %v1096_v13  ;;  %v978_v53 = vadd.f32 %v962_v36, %v884_v61  ;;  %v979_v35 = vadd.f32 %v963_v10, %v885_v15  ;;  %v754_v12 = vrot.slane %v650_v28, 7  ;;  %v810_v41 = vmul.f32 %v1767_v46, %v1982_v33  ;;  %v1204_v13 = vld [vmem:[%s1760_s24 + $0x78] sm:$0xff]  ;;  %v1197_v61 = vld [vmem:[%s1760_s24 + $0x40] sm:$0xff]  ;;  %v1198_v15 = vld [vmem:[%s1760_s24 + $0x48] sm:$0xff] }
 0x123   : >> { %v732_v26 = vadd.f32 %v716_v1, %v699_v62  ;;  %v733_v11 = vadd.f32 %v717_v14, %v700_v20  ;;  %v811_v30 = vmul.f32 %v1767_v46, %v1967_v22  ;;  %v843_v21 = vmul.f32 %v1770_v47, %v2152_v34 }
 0x124   : >> { %v1011_v31 = vadd.f32 %v995_v57, %v978_v53  ;;  %v1012_v23 = vadd.f32 %v996_v18, %v979_v35  ;;  %v2251_v29 = vsel %vm756_vm5, %v744_v16, %v754_v12  ;;  %v775_v36 = vsel %vm756_vm5, %v754_v12, %v744_v16 }
 0x125   : >> { %v2256_v10 = vmul.f32 %v1697_v56, %v775_v36  ;;  %v826_v33 = vadd.f32 %v810_v41, %v732_v26  ;;  %v827_v48 = vadd.f32 %v811_v30, %v733_v11  ;;  %v844_v22 = vmul.f32 %v1770_v47, %v2141_v25 }
 0x126   : >> { %v1044_v58 = vadd.f32 %v1028_v37, %v1011_v31  ;;  %v1045_v38 = vadd.f32 %v1029_v27, %v1012_v23  ;;  %v877_v53 = vmul.f32 %v1781_v63, %v2251_v29  ;;  %v904_v35 = vrot.slane %v649_v0, 1  ;;  %v2290_v31 = vld [vmem:[%s1790_s25 + $0x90] sm:$0xff] }
 0x127   : >> { %v859_v57 = vadd.f32 %v843_v21, %v826_v33  ;;  %v860_v18 = vadd.f32 %v844_v22, %v827_v48  ;;  %v876_v12 = vmul.f32 %v1781_v63, %v2256_v10  ;;  %v914_v16 = vrot.slane %v650_v28, 1 }
 0x128   : >> { %v1063_v26 = vadd.f32 %v1805_v9, %v1044_v58  ;;  %v1064_v39 = vadd.f32 %v1805_v9, %v1045_v38  ;;  %v970_v37 = vmul.f32 %v1784_v2, %v2014_v24  ;;  %v971_v27 = vmul.f32 %v1784_v2, %v2030_v4 }
 0x129   : >> { %v892_v0 = vadd.f32 %v876_v12, %v859_v57  ;;  %v893_v41 = vadd.f32 %v877_v53, %v860_v18  ;;  %v2273_v11 = vsel %vm916_vm6, %v904_v35, %v914_v16  ;;  %v935_v28 = vsel %vm916_vm6, %v914_v16, %v904_v35 }
 0x12a   : >> { %v1079_v1 = vmax.f32 %v1063_v26, 0.0  ;;  %v1080_v62 = vmax.f32 %v1064_v39, 0.0  ;;  %v2281_v24 = vmul.f32 %v1711_v60, %v935_v28  ;;  %v1003_v4 = vmul.f32 %v1799_v7, %v2164_v32 }
 0x12b   : >> { %v986_v20 = vadd.f32 %v970_v37, %v892_v0  ;;  %v987_v14 = vadd.f32 %v971_v27, %v893_v41  ;;  %v1004_v30 = vmul.f32 %v1799_v7, %v2173_v49  ;;  %v1036_v21 = vmul.f32 %v1802_v8, %v2273_v11 }
 0x12c   : >> { %v1093_v23 = vpack.c.bf16 %v1080_v62, %v1079_v1  ;;  %v1037_v36 = vmul.f32 %v1802_v8, %v2281_v24  ;;  %v1212_v33 = vpack.c.bf16 %v1204_v13, %v1203_v17  ;;  %v1209_v48 = vpack.c.bf16 %v1198_v15, %v1197_v61  ;;  %v2524_v13 = vld [vmem:[#allocation19_spill] sm:$0xff]  ;;  %v2525_v15 = vld [vmem:[#allocation20_spill] sm:$0xff] }
 0x12d   : >> { %v1019_v22 = vadd.f32 %v1003_v4, %v986_v20  ;;  %v1020_v58 = vadd.f32 %v1004_v30, %v987_v14  ;;  %v660_v38 = vmul.f32 %v1753_v43, %v2034_v55  ;;  %v661_v53 = vmul.f32 %v1753_v43, %v2043_v54  ;;  %v2523_v54 = vld [vmem:[#allocation12_spill] sm:$0xff]  ;;  %v2526_v62 = vld [vmem:[#allocation15_spill] sm:$0xff] }
 0x12e   : >> { %1427 = vmatmul.msk.bf16.gmra.mxu0 %vm336_vm2, %v1093_v23  ;;  %1441 = vmatmul.msk.bf16.gmra.mxu3 %vm395_vm1, %v1212_v33  ;;  %v677_v35 = vmul.f32 %v1756_v44, %v1867_v42  ;;  %v678_v57 = vmul.f32 %v1756_v44, %v1876_v3  ;;  %v710_v18 = vmul.f32 %v1763_v45, %v1879_v5  ;;  %v745_v12 = vrot.slane %v2290_v31, 7 }
 0x12f   : >> { %v1052_v16 = vadd.f32 %v1036_v21, %v1019_v22  ;;  %v1053_v55 = vadd.f32 %v1037_v36, %v1020_v58  ;;  %1438 = vmatmul.msk.bf16.gmra.mxu1 %vm395_vm1, %v1209_v48  ;;  %v711_v26 = vmul.f32 %v1763_v45, %v2523_v54  ;;  %v804_v39 = vmul.f32 %v1767_v46, %v2077_v50  ;;  %v2528_v21 = vld [vmem:[#allocation16_spill] sm:$0xff]  ;;  %v2529_v36 = vld [vmem:[#allocation18_spill] sm:$0xff]  ;;  %v2530_v48 = vld [vmem:[#allocation21_spill] sm:$0xff] }
 0x130   : >> { %v693_v37 = vadd.f32 %v677_v35, %v660_v38  ;;  %v694_v42 = vadd.f32 %v678_v57, %v661_v53  ;;  %v805_v44 = vmul.f32 %v1767_v46, %v2070_v51  ;;  %v837_v3 = vmul.f32 %v1770_v47, %v2517_v59  ;;  %v2531_v58 = vld [vmem:[#allocation22_spill] sm:$0xff]  ;;  %v2533_v54 = vld [vmem:[#allocation13_spill] sm:$0xff] }
 0x131   : >> { %v1071_v5 = vadd.f32 %v1805_v9, %v1052_v16  ;;  %v1072_v27 = vadd.f32 %v1805_v9, %v1053_v55  ;;  %v838_v17 = vmul.f32 %v1770_v47, %v2518_v52  ;;  %v870_v0 = vmul.f32 %v1781_v63, %v1978_v6  ;;  %v652_v52 = vld [vmem:[%s1790_s25 + $0x98] sm:$0xff]  ;;  %v2527_v6 = vld [vmem:[#allocation17_spill] sm:$0xff] }
 0x132   : >> { %v726_v50 = vadd.f32 %v710_v18, %v693_v37  ;;  %v727_v41 = vadd.f32 %v711_v26, %v694_v42  ;;  %v871_v28 = vmul.f32 %v1781_v63, %v1963_v19  ;;  %v964_v51 = vmul.f32 %v1784_v2, %v2524_v13  ;;  %v2532_v16 = vld [vmem:[#allocation14_spill] sm:$0xff] }
 0x133   : >> { %v1087_v61 = vmax.f32 %v1071_v5, 0.0  ;;  %v1088_v59 = vmax.f32 %v1072_v27, 0.0  ;;  %v965_v1 = vmul.f32 %v1784_v2, %v2525_v15  ;;  %v997_v4 = vmul.f32 %v1799_v7, %v2526_v62 }
 0x134   : >> { %v820_v20 = vadd.f32 %v804_v39, %v726_v50  ;;  %v821_v14 = vadd.f32 %v805_v44, %v727_v41  ;;  %v998_v30 = vmul.f32 %v1799_v7, %v2527_v6  ;;  %v1030_v19 = vmul.f32 %v1802_v8, %v2528_v21 }
 0x135   : >> { %v1097_v23 = vpack.c.bf16 %v1088_v59, %v1087_v61  ;;  %v1031_v33 = vmul.f32 %v1802_v8, %v2529_v36  ;;  %v668_v22 = vmul.f32 %v1753_v43, %v2530_v48  ;;  %v669_v38 = vmul.f32 %v1753_v43, %v2531_v58 }
 0x136   : >> { %v853_v53 = vadd.f32 %v837_v3, %v820_v20  ;;  %v854_v35 = vadd.f32 %v838_v17, %v821_v14  ;;  %v718_v57 = vmul.f32 %v1763_v45, %v2290_v31  ;;  %v719_v18 = vmul.f32 %v1763_v45, %v652_v52 }
 0x137   : >> { %1431 = vmatmul.msk.bf16.gmra.mxu2 %vm336_vm2, %v1097_v23  ;;  %v701_v55 = vadd.f32 %v2532_v16, %v668_v22  ;;  %v702_v26 = vadd.f32 %v2533_v54, %v669_v38  ;;  %v755_v39 = vrot.slane %v652_v52, 7  ;;  %v812_v37 = vmul.f32 %v1767_v46, %v2152_v34  ;;  %v2534_v16 = vld [vmem:[#allocation4_spill] sm:$0xff]  ;;  %v2535_v54 = vld [vmem:[#allocation11_spill] sm:$0xff] }
 0x138   : >> { %v886_v42 = vadd.f32 %v870_v0, %v853_v53  ;;  %v887_v44 = vadd.f32 %v871_v28, %v854_v35  ;;  %v813_v43 = vmul.f32 %v1767_v46, %v2141_v25  ;;  %v845_v3 = vmul.f32 %v1770_v47, %v2256_v10 }
 0x139   : >> { %v734_v5 = vadd.f32 %v718_v57, %v701_v55  ;;  %v735_v45 = vadd.f32 %v719_v18, %v702_v26  ;;  %v766_v27 = vsel %vm756_vm5, %v745_v12, %v755_v39  ;;  %v776_v17 = vsel %vm756_vm5, %v755_v39, %v745_v12 }
 0x13a   : >> { %v980_v50 = vadd.f32 %v964_v51, %v886_v42  ;;  %v981_v41 = vadd.f32 %v965_v1, %v887_v44  ;;  %v795_v34 = vmul.f32 %v1697_v56, %v776_v17  ;;  %v846_v0 = vmul.f32 %v1770_v47, %v2251_v29 }
 0x13b   : >> { %v828_v28 = vadd.f32 %v812_v37, %v734_v5  ;;  %v829_v46 = vadd.f32 %v813_v43, %v735_v45  ;;  %v879_v25 = vmul.f32 %v1781_v63, %v766_v27  ;;  %v905_v10 = vrot.slane %v2290_v31, 1 }
 0x13c   : >> { %v1013_v13 = vadd.f32 %v997_v4, %v980_v50  ;;  %v1014_v61 = vadd.f32 %v998_v30, %v981_v41  ;;  %v878_v59 = vmul.f32 %v1781_v63, %v795_v34  ;;  %v915_v15 = vrot.slane %v652_v52, 1 }
 0x13d   : >> { %v861_v62 = vadd.f32 %v845_v3, %v828_v28  ;;  %v862_v12 = vadd.f32 %v846_v0, %v829_v46  ;;  %v972_v51 = vmul.f32 %v1784_v2, %v2164_v32  ;;  %v973_v1 = vmul.f32 %v1784_v2, %v2173_v49 }
 0x13e   : >> { %v1046_v47 = vadd.f32 %v1030_v19, %v1013_v13  ;;  %v1047_v29 = vadd.f32 %v1031_v33, %v1014_v61  ;;  %v926_v20 = vsel %vm916_vm6, %v905_v10, %v915_v15  ;;  %v936_v31 = vsel %vm916_vm6, %v915_v15, %v905_v10 }
 0x13f   : >> { %v894_v4 = vadd.f32 %v878_v59, %v861_v62  ;;  %v895_v14 = vadd.f32 %v879_v25, %v862_v12  ;;  %v956_v63 = vmul.f32 %v1711_v60, %v936_v31  ;;  %v1005_v52 = vmul.f32 %v1799_v7, %v2273_v11 }
 0x140   : >> { %v1065_v32 = vadd.f32 %v1805_v9, %v1046_v47  ;;  %v1066_v6 = vadd.f32 %v1805_v9, %v1047_v29  ;;  %v1006_v2 = vmul.f32 %v1799_v7, %v2281_v24  ;;  %v1038_v21 = vmul.f32 %v1802_v8, %v926_v20 }
 0x141   : >> { %v988_v49 = vadd.f32 %v972_v51, %v894_v4  ;;  %v989_v30 = vadd.f32 %v973_v1, %v895_v14  ;;  %v1039_v19 = vmul.f32 %v1802_v8, %v956_v63  ;;  %v2385_v55 = vperm.slane %v2534_v16, 0 }
 0x142   : >> { %v1081_v23 = vmax.f32 %v1065_v32, 0.0  ;;  %v1082_v36 = vmax.f32 %v1066_v6, 0.0  ;;  %v2388_v26 = vperm.slane %v2535_v54, 0 }
 0x143   : >> { %v1021_v33 = vadd.f32 %v1005_v52, %v988_v49  ;;  %v1022_v48 = vadd.f32 %v1006_v2, %v989_v30 }
 0x144   : >> { %v1094_v22 = vpack.c.bf16 %v1082_v36, %v1081_v23 }
 0x145   : >> { %v1054_v58 = vadd.f32 %v1038_v21, %v1021_v33  ;;  %v1055_v11 = vadd.f32 %v1039_v19, %v1022_v48 }
 0x146   : >> { %1428 = vmatmul.msk.bf16.gmra.mxu0 %vm336_vm2, %v1094_v22 }
 0x147   : >> { %v1073_v38 = vadd.f32 %v1805_v9, %v1054_v58  ;;  %v1074_v7 = vadd.f32 %v1805_v9, %v1055_v11 }
 0x149   : >> { %v1089_v24 = vmax.f32 %v1073_v38, 0.0  ;;  %v1090_v53 = vmax.f32 %v1074_v7, 0.0 }
 0x14b   : >> { %v1098_v35 = vpack.c.bf16 %v1090_v53, %v1089_v24 }
 0x14d   : >> { %1432 = vmatmul.msk.bf16.gmra.mxu2 %vm336_vm2, %v1098_v35 }
 0x157   : >> { %v1252_v8 = vpop.f32.mrf.mxu1 }
 0x158   : >> { %v1253_v37 = vadd.f32 %v1252_v8, %v2385_v55 }
 0x15f   : >> { %v1254_v57 = vpop.f32.mrf.mxu1 }
 0x160   : >> { %v1255_v3 = vadd.f32 %v1254_v57, %v2385_v55 }
 0x167   : >> { %v1257_v18 = vpop.f32.mrf.mxu1 }
 0x168   : >> { %v1258_v34 = vadd.f32 %v1257_v18, %v2385_v55 }
 0x16f   : >> { %v1259_v44 = vpop.f32.mrf.mxu1 }
 0x170   : >> { %v1260_v10 = vadd.f32 %v1259_v44, %v2385_v55 }
 0x175   : >> { %v1147_v39 = vpop.f32.mrf.mxu0 }
 0x176   : >> { %v1148_v42 = vadd.f32 %v1147_v39, %v2388_v26 }
 0x178   : >> { %v1292_v9 = vadd.f32 %v1253_v37, %v1148_v42  ;;  %v1262_v27 = vpop.f32.mrf.mxu1 }
 0x179   : >> { %v1263_v31 = vadd.f32 %v1262_v27, %v2385_v55 }
 0x17a   : >> { %1310 = vst.msk [vmem:[%s2394_s26] sm:$0xff] %vm1309_vm7, %v1292_v9 }
 0x17d   : >> { %v1149_v43 = vpop.f32.mrf.mxu0  ;;  %v1277_v15 = vpop.f32.mrf.mxu3 }
 0x17e   : >> { %v1150_v5 = vadd.f32 %v1149_v43, %v2388_v26  ;;  %v1278_v12 = vadd.f32 %v1277_v15, %v2385_v55 }
 0x180   : >> { %v1293_v45 = vadd.f32 %v1255_v3, %v1150_v5  ;;  %v1264_v17 = vpop.f32.mrf.mxu1 }
 0x181   : >> { %v1265_v23 = vadd.f32 %v1264_v17, %v2385_v55 }
 0x182   : >> { %1311 = vst.msk [vmem:[%s2394_s26 + $0x8] sm:$0xff] %vm1309_vm7, %v1293_v45 }
 0x185   : >> { %v1279_v29 = vpop.f32.mrf.mxu3 }
 0x186   : >> { %v1280_v6 = vadd.f32 %v1279_v29, %v2385_v55 }
 0x18d   : >> { %v1167_v50 = vpop.f32.mrf.mxu2 }
 0x18e   : >> { %v1168_v63 = vadd.f32 %v1167_v50, %v2388_v26 }
 0x192   : >> { %v1152_v41 = vpop.f32.mrf.mxu0 }
 0x193   : >> { %v1153_v0 = vadd.f32 %v1152_v41, %v2388_v26 }
 0x194   : >> { %v1267_v46 = vpop.f32.mrf.mxu1 }
 0x195   : >> { %v1294_v28 = vadd.f32 %v1258_v34, %v1153_v0  ;;  %v1169_v13 = vpop.f32.mrf.mxu2  ;;  %v1268_v39 = vadd.f32 %v1267_v46, %v2385_v55 }
 0x196   : >> { %v1170_v48 = vadd.f32 %v1169_v13, %v2388_v26 }
 0x197   : >> { %1312 = vst.msk [vmem:[%s2394_s26 + $0x10] sm:$0xff] %vm1309_vm7, %v1294_v28 }
 0x199   : >> { %v1282_v58 = vpop.f32.mrf.mxu3 }
 0x19a   : >> { %v1154_v25 = vpop.f32.mrf.mxu0  ;;  %v1283_v7 = vadd.f32 %v1282_v58, %v2385_v55 }
 0x19b   : >> { %v1155_v61 = vadd.f32 %v1154_v25, %v2388_v26 }
 0x19c   : >> { %v1269_v62 = vpop.f32.mrf.mxu1 }
 0x19d   : >> { %v1295_v59 = vadd.f32 %v1260_v10, %v1155_v61  ;;  %v1270_v43 = vadd.f32 %v1269_v62, %v2385_v55 }
 0x19f   : >> { %1313 = vst.msk [vmem:[%s2394_s26 + $0x18] sm:$0xff] %vm1309_vm7, %v1295_v59 }
 0x1a1   : >> { %v1284_v8 = vpop.f32.mrf.mxu3 }
 0x1a2   : >> { %v1285_v18 = vadd.f32 %v1284_v8, %v2385_v55 }
 0x1a5   : >> { %v1172_v51 = vpop.f32.mrf.mxu2 }
 0x1a6   : >> { %v1173_v1 = vadd.f32 %v1172_v51, %v2388_v26 }
 0x1a8   : >> { %v1302_v47 = vadd.f32 %v1278_v12, %v1173_v1 }
 0x1aa   : >> { %1320 = vst.msk [vmem:[%s2394_s26 + $0x50] sm:$0xff] %vm1309_vm7, %v1302_v47 }
 0x1ab   : >> { %v1157_v20 = vpop.f32.mrf.mxu0 }
 0x1ac   : >> { %v1158_v4 = vadd.f32 %v1157_v20, %v2388_v26  ;;  %v1272_v14 = vpop.f32.mrf.mxu1 }
 0x1ad   : >> { %v1174_v52 = vpop.f32.mrf.mxu2  ;;  %v1273_v32 = vadd.f32 %v1272_v14, %v2385_v55 }
 0x1ae   : >> { %v1175_v2 = vadd.f32 %v1174_v52, %v2388_v26  ;;  %v1296_v49 = vadd.f32 %v1263_v31, %v1158_v4 }
 0x1af   : >> { %v1300_v30 = vadd.f32 %v1273_v32, %v1168_v63 }
 0x1b0   : >> { %v1303_v21 = vadd.f32 %v1280_v6, %v1175_v2  ;;  %1314 = vst.msk [vmem:[%s2394_s26 + $0x20] sm:$0xff] %vm1309_vm7, %v1296_v49 }
 0x1b1   : >> { %1318 = vst.msk [vmem:[%s2394_s26 + $0x40] sm:$0xff] %vm1309_vm7, %v1300_v30  ;;  %v1287_v3 = vpop.f32.mrf.mxu3 }
 0x1b2   : >> { %1321 = vst.msk [vmem:[%s2394_s26 + $0x58] sm:$0xff] %vm1309_vm7, %v1303_v21  ;;  %v1288_v27 = vadd.f32 %v1287_v3, %v2385_v55 }
 0x1b3   : >> { %v1159_v19 = vpop.f32.mrf.mxu0 }
 0x1b4   : >> { %v1160_v36 = vadd.f32 %v1159_v19, %v2388_v26  ;;  %v1274_v33 = vpop.f32.mrf.mxu1 }
 0x1b5   : >> { %v1275_v22 = vadd.f32 %v1274_v33, %v2385_v55 }
 0x1b6   : >> { %v1297_v11 = vadd.f32 %v1265_v23, %v1160_v36 }
 0x1b7   : >> { %v1301_v38 = vadd.f32 %v1275_v22, %v1170_v48 }
 0x1b8   : >> { %1315 = vst.msk [vmem:[%s2394_s26 + $0x28] sm:$0xff] %vm1309_vm7, %v1297_v11 }
 0x1b9   : >> { %1319 = vst.msk [vmem:[%s2394_s26 + $0x48] sm:$0xff] %vm1309_vm7, %v1301_v38  ;;  %v1289_v34 = vpop.f32.mrf.mxu3 }
 0x1ba   : >> { %v1177_v24 = vpop.f32.mrf.mxu2  ;;  %v1290_v28 = vadd.f32 %v1289_v34, %v2385_v55 }
 0x1bb   : >> { %v1178_v53 = vadd.f32 %v1177_v24, %v2388_v26 }
 0x1bd   : >> { %v1304_v35 = vadd.f32 %v1283_v7, %v1178_v53 }
 0x1bf   : >> { %1322 = vst.msk [vmem:[%s2394_s26 + $0x60] sm:$0xff] %vm1309_vm7, %v1304_v35 }
 0x1c2   : >> { %v1179_v57 = vpop.f32.mrf.mxu2 }
 0x1c3   : >> { %v1180_v16 = vadd.f32 %v1179_v57, %v2388_v26  ;;  %v1162_v54 = vpop.f32.mrf.mxu0 }
 0x1c4   : >> { %v1163_v37 = vadd.f32 %v1162_v54, %v2388_v26 }
 0x1c5   : >> { %v1305_v42 = vadd.f32 %v1285_v18, %v1180_v16 }
 0x1c6   : >> { %v1298_v9 = vadd.f32 %v1268_v39, %v1163_v37 }
 0x1c7   : >> { %1323 = vst.msk [vmem:[%s2394_s26 + $0x68] sm:$0xff] %vm1309_vm7, %v1305_v42 }
 0x1c8   : >> { %1316 = vst.msk [vmem:[%s2394_s26 + $0x30] sm:$0xff] %vm1309_vm7, %v1298_v9 }
 0x1cb   : >> { %v1164_v44 = vpop.f32.mrf.mxu0 }
 0x1cc   : >> { %v1165_v5 = vadd.f32 %v1164_v44, %v2388_v26 }
 0x1ce   : >> { %v1299_v45 = vadd.f32 %v1270_v43, %v1165_v5 }
 0x1d0   : >> { %v1182_v17 = vpop.f32.mrf.mxu2  ;;  %1317 = vst.msk [vmem:[%s2394_s26 + $0x38] sm:$0xff] %vm1309_vm7, %v1299_v45 }
 0x1d1   : >> { %v1183_v50 = vadd.f32 %v1182_v17, %v2388_v26 }
 0x1d3   : >> { %v1306_v41 = vadd.f32 %v1288_v27, %v1183_v50 }
 0x1d5   : >> { %1324 = vst.msk [vmem:[%s2394_s26 + $0x70] sm:$0xff] %vm1309_vm7, %v1306_v41 }
 0x1d8   : >> { %v1184_v0 = vpop.f32.mrf.mxu2 }
 0x1d9   : >> { %v1185_v46 = vadd.f32 %v1184_v0, %v2388_v26  ;;  %628 = sbr.rel (!%p626_p4) target bundleno = 213 (0xd5), region = 98 }
 0x1db   : >> { %v1307_v25 = vadd.f32 %v1290_v28, %v1185_v46 }
 0x1dd   : >> { %1325 = vst.msk [vmem:[%s2394_s26 + $0x78] sm:$0xff] %vm1309_vm7, %v1307_v25 }
 0x1de PF: > { %s19_s30 = sadd.s32 1, %s1482_s30  }
 0x1df   : > { %p16_p5 = scmp.ge.s32.totalorder %s19_s30, 4  }
 0x1e1   :  { %18 = sbr.rel (!%p16_p5) target bundleno = 1 (0x1), region = 109 }

</bundles_post_ra>
